<compile_context>
chip_gen: v7x
topology: tpu7x:2x2x1
jax: 0.10.0
libtpu: 0.0.40
codegen_flags: <defaults>
</compile_context>

<pallas_src>
import functools

import jax
import jax.numpy as jnp
from jax.experimental import pallas as pl
from jax.experimental.pallas import tpu as pltpu


def _round_up(x: int, m: int) -> int:
    return ((x + m - 1) // m) * m


def _resblock_kernel(x_ref, w_ref, b_ref, o_ref, *, depth: int):
    # x_ref: (tile_b, Wp) f32      current batch tile
    # w_ref: (depth, Wp, Wp) bf16  all layer weights (in x out), VMEM-resident
    # b_ref: (depth, 1, Wp) f32    all layer biases, VMEM-resident
    x0 = x_ref[...]                      # residual, kept in the input dtype (f32)
    h_lo = x0.astype(jnp.bfloat16)       # bf16 operand for the MXU
    h_hi = x0
    for i in range(depth):               # small static depth -> unrolled
        acc = jnp.dot(h_lo, w_ref[i], preferred_element_type=jnp.float32)
        acc = acc + b_ref[i]
        h_hi = jnp.tanh(acc)             # f32 tanh on the EUP (v5e-safe)
        h_lo = h_hi.astype(jnp.bfloat16)
    o_ref[...] = (h_hi + x0).astype(o_ref.dtype)


def _build_call(depth, Bp, Wp, tile_b, cost, single_buffer_resident):
    resident_kwargs = {}
    if single_buffer_resident:
        # Constant index_map -> the block never changes; no need to double-buffer.
        resident_kwargs = dict(pipeline_mode=pl.Buffered(buffer_count=1))
    in_specs = [
        pl.BlockSpec((tile_b, Wp), lambda i: (i, 0)),                           # x tile
        pl.BlockSpec((depth, Wp, Wp), lambda i: (0, 0, 0), **resident_kwargs),  # weights
        pl.BlockSpec((depth, 1, Wp), lambda i: (0, 0, 0), **resident_kwargs),   # biases
    ]
    return pl.pallas_call(
        functools.partial(_resblock_kernel, depth=depth),
        out_shape=jax.ShapeDtypeStruct((Bp, Wp), jnp.float32),
        grid_spec=pltpu.PrefetchScalarGridSpec(
            num_scalar_prefetch=0,
            grid=(Bp // tile_b,),
            in_specs=in_specs,
            out_specs=pl.BlockSpec((tile_b, Wp), lambda i: (i, 0)),
        ),
        compiler_params=pltpu.CompilerParams(
            dimension_semantics=("parallel",)),  # megacore-shard the batch axis
        cost_estimate=cost,
    )


def resblock(x, weights_t, biases, *, tile_b: int = 256):
    """x: [B, W] f32; weights_t: [depth, W, W] (in x out); biases: [depth, 1, W]."""
    B, W = x.shape
    depth = weights_t.shape[0]
    out_dtype = x.dtype

    # Lane-dense feature dim (multiple of 128) and sublane-aligned batch tile.
    Wp = _round_up(max(W, 128), 128)
    tile_b = _round_up(min(tile_b, _round_up(B, 8)), 8)
    Bp = _round_up(B, tile_b)

    # Zero-pad. Padded feature lanes stay exactly zero through every layer
    # (zero weight rows/cols + zero bias + tanh(0)=0), so slicing back is exact.
    xp = jnp.zeros((Bp, Wp), jnp.float32).at[:B, :W].set(x.astype(jnp.float32))
    wp = (jnp.zeros((depth, Wp, Wp), jnp.bfloat16)
          .at[:, :W, :W].set(weights_t.astype(jnp.bfloat16)))
    bp = (jnp.zeros((depth, 1, Wp), jnp.float32)
          .at[:, :, :W].set(biases.astype(jnp.float32)))

    cost = pl.CostEstimate(
        flops=2 * Bp * Wp * Wp * depth,
        transcendentals=Bp * Wp * depth,
        bytes_accessed=(xp.size + Bp * Wp + bp.size) * 4 + wp.size * 2,
    )

    # TODO(synk): for very large depth*Wp^2 (v7x 64 MiB VMEM), stream one layer's
    # weights per grid step (depth on an "arbitrary" axis) instead of keeping all
    # layers resident.
    try:
        out = _build_call(depth, Bp, Wp, tile_b, cost, True)(xp, wp, bp)
        out = jax.block_until_ready(out)
    except Exception:
        # Fallback for jax versions without BlockSpec(pipeline_mode=pl.Buffered).
        out = _build_call(depth, Bp, Wp, tile_b, cost, False)(xp, wp, bp)

    return out[:B, :W].astype(out_dtype)


def reference_resblock_mixed(x, weights_t, biases):
    # Mirrors the kernel's mixed-precision recipe (bf16 operands, f32 accumulate).
    x0 = x.astype(jnp.float32)
    h_lo = x0.astype(jnp.bfloat16)
    h_hi = x0
    for i in range(weights_t.shape[0]):
        acc = jnp.dot(h_lo, weights_t[i].astype(jnp.bfloat16),
                      preferred_element_type=jnp.float32) + biases[i]
        h_hi = jnp.tanh(acc)
        h_lo = h_hi.astype(jnp.bfloat16)
    return (h_hi + x0).astype(x.dtype)


def reference_resblock_f32(x, weights_t, biases):
    # Full-precision reference matching the PyTorch module semantics.
    h = x.astype(jnp.float32)
    x0 = h
    for i in range(weights_t.shape[0]):
        h = jnp.tanh(h @ weights_t[i] + biases[i])
    return (h + x0).astype(x.dtype)


if __name__ == "__main__":
    WIDTH = 32
    DEPTH = 3
    BATCH = 1024   # 4 grid steps of 256 rows -> both v7x TensorCores get work

    key = jax.random.PRNGKey(0)
    kx, kw, kb = jax.random.split(key, 3)

    # PyTorch-style uniform(-1/sqrt(W), 1/sqrt(W)) init; Linear weight is
    # [out, in], transposed to [in, out] for the kernel's h @ w convention.
    bound = 1.0 / (WIDTH ** 0.5)
    w_torch = jax.random.uniform(
        kw, (DEPTH, WIDTH, WIDTH), jnp.float32, minval=-bound, maxval=bound)
    b = jax.random.uniform(
        kb, (DEPTH, 1, WIDTH), jnp.float32, minval=-bound, maxval=bound)
    w_t = jnp.transpose(w_torch, (0, 2, 1))  # [depth, in, out]

    x = jax.random.normal(kx, (BATCH, WIDTH), jnp.float32)

    out = resblock(x, w_t, b, tile_b=256)
    out = jax.block_until_ready(out)

    ref_mixed = reference_resblock_mixed(x, w_t, b)
    ref_f32 = reference_resblock_f32(x, w_t, b)

    assert out.shape == x.shape and out.dtype == x.dtype
    # Matches the bf16-operand / f32-accumulate recipe almost exactly...
    assert jnp.allclose(out, ref_mixed, atol=2e-3, rtol=2e-3)
    # ...and stays close to the full-f32 module semantics.
    assert jnp.allclose(out, ref_f32, atol=5e-2, rtol=5e-2)
    print("KERNEL_OK")
</pallas_src>

<mosaic_0001>
module attributes {stable_mosaic.version = 11 : i64} {
  func.func @_resblock_kernel(%arg0: i32, %arg1: memref<256x128xf32, #tpu.memory_space<vmem>>, %arg2: memref<3x128x128xbf16, #tpu.memory_space<vmem>>, %arg3: memref<3x1x128xf32, #tpu.memory_space<vmem>>, %arg4: memref<256x128xf32, #tpu.memory_space<vmem>>) attributes {dimension_semantics = [#tpu.dimension_semantics<parallel>], iteration_bounds = array<i64: 4>, scalar_prefetch = 0 : i64, scratch_operands = 0 : i64, tpu.core_type = #tpu.core_type<tc>, window_params = [{transform_indices = @transform_0, window_bounds = array<i64: 256, 128>}, {pipeline_mode = #tpu.pipeline_mode<synchronous>, transform_indices = @transform_1, window_bounds = array<i64: 3, 128, 128>}, {pipeline_mode = #tpu.pipeline_mode<synchronous>, transform_indices = @transform_2, window_bounds = array<i64: 3, 1, 128>}, {transform_indices = @transform_3, window_bounds = array<i64: 256, 128>}]} {
    %c0 = arith.constant 0 : index
    %c0_0 = arith.constant 0 : index
    %0 = vector.load %arg1[%c0, %c0_0] : memref<256x128xf32, #tpu.memory_space<vmem>>, vector<256x128xf32>
    %1 = arith.truncf %0 : vector<256x128xf32> to vector<256x128xbf16>
    %c0_1 = arith.constant 0 : index
    %c0_2 = arith.constant 0 : index
    %c0_3 = arith.constant 0 : index
    %2 = vector.load %arg2[%c0_1, %c0_2, %c0_3] : memref<3x128x128xbf16, #tpu.memory_space<vmem>>, vector<1x128x128xbf16>
    %3 = vector.shape_cast %2 : vector<1x128x128xbf16> to vector<128x128xbf16>
    %cst = arith.constant dense<0.000000e+00> : vector<256x128xf32>
    %4 = tpu.matmul %1, %3, %cst {dimension_numbers = #tpu.dot_dimension_numbers<[1], [0], [0], [1], [0, 0, 1, 1], [], []>} : vector<256x128xbf16>, vector<128x128xbf16>, vector<256x128xf32> -> vector<256x128xf32>
    %c0_4 = arith.constant 0 : index
    %c0_5 = arith.constant 0 : index
    %c0_6 = arith.constant 0 : index
    %5 = vector.load %arg3[%c0_4, %c0_5, %c0_6] : memref<3x1x128xf32, #tpu.memory_space<vmem>>, vector<1x1x128xf32>
    %6 = vector.shape_cast %5 : vector<1x1x128xf32> to vector<1x128xf32>
    %7 = vector.broadcast %6 : vector<1x128xf32> to vector<256x128xf32>
    %8 = arith.addf %4, %7 : vector<256x128xf32>
    %9 = math.tanh %8 : vector<256x128xf32>
    %10 = arith.truncf %9 : vector<256x128xf32> to vector<256x128xbf16>
    %c1 = arith.constant 1 : index
    %c0_7 = arith.constant 0 : index
    %c0_8 = arith.constant 0 : index
    %11 = vector.load %arg2[%c1, %c0_7, %c0_8] : memref<3x128x128xbf16, #tpu.memory_space<vmem>>, vector<1x128x128xbf16>
    %12 = vector.shape_cast %11 : vector<1x128x128xbf16> to vector<128x128xbf16>
    %cst_9 = arith.constant dense<0.000000e+00> : vector<256x128xf32>
    %13 = tpu.matmul %10, %12, %cst_9 {dimension_numbers = #tpu.dot_dimension_numbers<[1], [0], [0], [1], [0, 0, 1, 1], [], []>} : vector<256x128xbf16>, vector<128x128xbf16>, vector<256x128xf32> -> vector<256x128xf32>
    %c1_10 = arith.constant 1 : index
    %c0_11 = arith.constant 0 : index
    %c0_12 = arith.constant 0 : index
    %14 = vector.load %arg3[%c1_10, %c0_11, %c0_12] : memref<3x1x128xf32, #tpu.memory_space<vmem>>, vector<1x1x128xf32>
    %15 = vector.shape_cast %14 : vector<1x1x128xf32> to vector<1x128xf32>
    %16 = vector.broadcast %15 : vector<1x128xf32> to vector<256x128xf32>
    %17 = arith.addf %13, %16 : vector<256x128xf32>
    %18 = math.tanh %17 : vector<256x128xf32>
    %19 = arith.truncf %18 : vector<256x128xf32> to vector<256x128xbf16>
    %c2 = arith.constant 2 : index
    %c0_13 = arith.constant 0 : index
    %c0_14 = arith.constant 0 : index
    %20 = vector.load %arg2[%c2, %c0_13, %c0_14] : memref<3x128x128xbf16, #tpu.memory_space<vmem>>, vector<1x128x128xbf16>
    %21 = vector.shape_cast %20 : vector<1x128x128xbf16> to vector<128x128xbf16>
    %cst_15 = arith.constant dense<0.000000e+00> : vector<256x128xf32>
    %22 = tpu.matmul %19, %21, %cst_15 {dimension_numbers = #tpu.dot_dimension_numbers<[1], [0], [0], [1], [0, 0, 1, 1], [], []>} : vector<256x128xbf16>, vector<128x128xbf16>, vector<256x128xf32> -> vector<256x128xf32>
    %c2_16 = arith.constant 2 : index
    %c0_17 = arith.constant 0 : index
    %c0_18 = arith.constant 0 : index
    %23 = vector.load %arg3[%c2_16, %c0_17, %c0_18] : memref<3x1x128xf32, #tpu.memory_space<vmem>>, vector<1x1x128xf32>
    %24 = vector.shape_cast %23 : vector<1x1x128xf32> to vector<1x128xf32>
    %25 = vector.broadcast %24 : vector<1x128xf32> to vector<256x128xf32>
    %26 = arith.addf %22, %25 : vector<256x128xf32>
    %27 = math.tanh %26 : vector<256x128xf32>
    %28 = arith.addf %27, %0 : vector<256x128xf32>
    %c0_19 = arith.constant 0 : index
    %c0_20 = arith.constant 0 : index
    %29 = vector.load %arg4[%c0_19, %c0_20] : memref<256x128xf32, #tpu.memory_space<vmem>>, vector<256x128xf32>
    tpu.vector_store %arg4[%c0_19, %c0_20], %28 {strides = array<i32>} : memref<256x128xf32, #tpu.memory_space<vmem>>, vector<256x128xf32>,
    return
  }
  func.func @transform_0(%arg0: i32) -> (i32, i32) {
    %c0_i32 = arith.constant 0 : i32
    %c0_i32_0 = arith.constant 0 : i32
    return %arg0, %c0_i32 : i32, i32
  }
  func.func @transform_1(%arg0: i32) -> (i32, i32, i32) {
    %c0_i32 = arith.constant 0 : i32
    %c0_i32_0 = arith.constant 0 : i32
    %c0_i32_1 = arith.constant 0 : i32
    %c0_i32_2 = arith.constant 0 : i32
    return %c0_i32, %c0_i32_0, %c0_i32_1 : i32, i32, i32
  }
  func.func @transform_2(%arg0: i32) -> (i32, i32, i32) {
    %c0_i32 = arith.constant 0 : i32
    %c0_i32_0 = arith.constant 0 : i32
    %c0_i32_1 = arith.constant 0 : i32
    %c0_i32_2 = arith.constant 0 : i32
    return %c0_i32, %c0_i32_0, %c0_i32_1 : i32, i32, i32
  }
  func.func @transform_3(%arg0: i32) -> (i32, i32) {
    %c0_i32 = arith.constant 0 : i32
    %c0_i32_0 = arith.constant 0 : i32
    return %arg0, %c0_i32 : i32, i32
  }
}

module attributes {stable_mosaic.version = 11 : i64} {
  func.func @_resblock_kernel(%arg0: i32, %arg1: memref<256x128xf32, #tpu.memory_space<vmem>>, %arg2: memref<3x128x128xbf16, #tpu.memory_space<vmem>>, %arg3: memref<3x1x128xf32, #tpu.memory_space<vmem>>, %arg4: memref<256x128xf32, #tpu.memory_space<vmem>>) attributes {dimension_semantics = [#tpu.dimension_semantics<parallel>], iteration_bounds = array<i64: 4>, scalar_prefetch = 0 : i64, scratch_operands = 0 : i64, tpu.core_type = #tpu.core_type<tc>, window_params = [{transform_indices = @transform_0, window_bounds = array<i64: 256, 128>}, {pipeline_mode = #tpu.pipeline_mode<synchronous>, transform_indices = @transform_1, window_bounds = array<i64: 3, 128, 128>}, {pipeline_mode = #tpu.pipeline_mode<synchronous>, transform_indices = @transform_2, window_bounds = array<i64: 3, 1, 128>}, {transform_indices = @transform_3, window_bounds = array<i64: 256, 128>}]} {
    %c0 = arith.constant 0 : index
    %c0_0 = arith.constant 0 : index
    %0 = vector.load %arg1[%c0, %c0_0] : memref<256x128xf32, #tpu.memory_space<vmem>>, vector<256x128xf32>
    %1 = arith.truncf %0 : vector<256x128xf32> to vector<256x128xbf16>
    %c0_1 = arith.constant 0 : index
    %c0_2 = arith.constant 0 : index
    %c0_3 = arith.constant 0 : index
    %2 = vector.load %arg2[%c0_1, %c0_2, %c0_3] : memref<3x128x128xbf16, #tpu.memory_space<vmem>>, vector<1x128x128xbf16>
    %3 = vector.shape_cast %2 : vector<1x128x128xbf16> to vector<128x128xbf16>
    %cst = arith.constant dense<0.000000e+00> : vector<256x128xf32>
    %4 = tpu.matmul %1, %3, %cst {dimension_numbers = #tpu.dot_dimension_numbers<[1], [0], [0], [1], [0, 0, 1, 1], [], []>} : vector<256x128xbf16>, vector<128x128xbf16>, vector<256x128xf32> -> vector<256x128xf32>
    %c0_4 = arith.constant 0 : index
    %c0_5 = arith.constant 0 : index
    %c0_6 = arith.constant 0 : index
    %5 = vector.load %arg3[%c0_4, %c0_5, %c0_6] : memref<3x1x128xf32, #tpu.memory_space<vmem>>, vector<1x1x128xf32>
    %6 = vector.shape_cast %5 : vector<1x1x128xf32> to vector<1x128xf32>
    %7 = vector.broadcast %6 : vector<1x128xf32> to vector<256x128xf32>
    %8 = arith.addf %4, %7 : vector<256x128xf32>
    %9 = math.tanh %8 : vector<256x128xf32>
    %10 = arith.truncf %9 : vector<256x128xf32> to vector<256x128xbf16>
    %c1 = arith.constant 1 : index
    %c0_7 = arith.constant 0 : index
    %c0_8 = arith.constant 0 : index
    %11 = vector.load %arg2[%c1, %c0_7, %c0_8] : memref<3x128x128xbf16, #tpu.memory_space<vmem>>, vector<1x128x128xbf16>
    %12 = vector.shape_cast %11 : vector<1x128x128xbf16> to vector<128x128xbf16>
    %cst_9 = arith.constant dense<0.000000e+00> : vector<256x128xf32>
    %13 = tpu.matmul %10, %12, %cst_9 {dimension_numbers = #tpu.dot_dimension_numbers<[1], [0], [0], [1], [0, 0, 1, 1], [], []>} : vector<256x128xbf16>, vector<128x128xbf16>, vector<256x128xf32> -> vector<256x128xf32>
    %c1_10 = arith.constant 1 : index
    %c0_11 = arith.constant 0 : index
    %c0_12 = arith.constant 0 : index
    %14 = vector.load %arg3[%c1_10, %c0_11, %c0_12] : memref<3x1x128xf32, #tpu.memory_space<vmem>>, vector<1x1x128xf32>
    %15 = vector.shape_cast %14 : vector<1x1x128xf32> to vector<1x128xf32>
    %16 = vector.broadcast %15 : vector<1x128xf32> to vector<256x128xf32>
    %17 = arith.addf %13, %16 : vector<256x128xf32>
    %18 = math.tanh %17 : vector<256x128xf32>
    %19 = arith.truncf %18 : vector<256x128xf32> to vector<256x128xbf16>
    %c2 = arith.constant 2 : index
    %c0_13 = arith.constant 0 : index
    %c0_14 = arith.constant 0 : index
    %20 = vector.load %arg2[%c2, %c0_13, %c0_14] : memref<3x128x128xbf16, #tpu.memory_space<vmem>>, vector<1x128x128xbf16>
    %21 = vector.shape_cast %20 : vector<1x128x128xbf16> to vector<128x128xbf16>
    %cst_15 = arith.constant dense<0.000000e+00> : vector<256x128xf32>
    %22 = tpu.matmul %19, %21, %cst_15 {dimension_numbers = #tpu.dot_dimension_numbers<[1], [0], [0], [1], [0, 0, 1, 1], [], []>} : vector<256x128xbf16>, vector<128x128xbf16>, vector<256x128xf32> -> vector<256x128xf32>
    %c2_16 = arith.constant 2 : index
    %c0_17 = arith.constant 0 : index
    %c0_18 = arith.constant 0 : index
    %23 = vector.load %arg3[%c2_16, %c0_17, %c0_18] : memref<3x1x128xf32, #tpu.memory_space<vmem>>, vector<1x1x128xf32>
    %24 = vector.shape_cast %23 : vector<1x1x128xf32> to vector<1x128xf32>
    %25 = vector.broadcast %24 : vector<1x128xf32> to vector<256x128xf32>
    %26 = arith.addf %22, %25 : vector<256x128xf32>
    %27 = math.tanh %26 : vector<256x128xf32>
    %28 = arith.addf %27, %0 : vector<256x128xf32>
    %c0_19 = arith.constant 0 : index
    %c0_20 = arith.constant 0 : index
    %29 = vector.load %arg4[%c0_19, %c0_20] : memref<256x128xf32, #tpu.memory_space<vmem>>, vector<256x128xf32>
    tpu.vector_store %arg4[%c0_19, %c0_20], %28 {strides = array<i32>} : memref<256x128xf32, #tpu.memory_space<vmem>>, vector<256x128xf32>,
    return
  }
  func.func @transform_0(%arg0: i32) -> (i32, i32) {
    %c0_i32 = arith.constant 0 : i32
    %c0_i32_0 = arith.constant 0 : i32
    return %arg0, %c0_i32 : i32, i32
  }
  func.func @transform_1(%arg0: i32) -> (i32, i32, i32) {
    %c0_i32 = arith.constant 0 : i32
    %c0_i32_0 = arith.constant 0 : i32
    %c0_i32_1 = arith.constant 0 : i32
    %c0_i32_2 = arith.constant 0 : i32
    return %c0_i32, %c0_i32_0, %c0_i32_1 : i32, i32, i32
  }
  func.func @transform_2(%arg0: i32) -> (i32, i32, i32) {
    %c0_i32 = arith.constant 0 : i32
    %c0_i32_0 = arith.constant 0 : i32
    %c0_i32_1 = arith.constant 0 : i32
    %c0_i32_2 = arith.constant 0 : i32
    return %c0_i32, %c0_i32_0, %c0_i32_1 : i32, i32, i32
  }
  func.func @transform_3(%arg0: i32) -> (i32, i32) {
    %c0_i32 = arith.constant 0 : i32
    %c0_i32_0 = arith.constant 0 : i32
    return %arg0, %c0_i32 : i32, i32
  }
}

</mosaic_0001>

<bundles_post_ra>
// kernel: tpu_custom_call.1
= control target key start
LH: loop header
LB: loop body
LE: loop exit
PB: predicated region body
PF: predicated region fallthrough
CT: control target
= control target key end

     0   :  { %8 = vsyncpa [#allocation3], 0  ;;  %s2450_s0 = inlined_call_operand.hbm [shape: f32[1024,128], index: 0, kind: input, shape index: {}]   ;;  %s2451_s1 = inlined_call_operand.hbm [shape: bf16[3,128,128], index: 1, kind: input, shape index: {}]   ;;  %s2452_s2 = inlined_call_operand.vmem [shape: f32[3,1,128], index: 2, kind: input, shape index: {}]   ;;  %s2453_s3 = inlined_call_operand.hbm [shape: f32[1024,128], index: 3, kind: output, shape index: {}]  }
   0x1   :  { %10 = vsyncpa [#allocation3 + $0x1], 0 }
   0x2   :  { %11 = vsyncpa [#allocation6], 0 }
   0x3   :  { %12 = vsyncpa [#allocation4], 0 }
   0x4   :  { %14 = vsyncpa [#allocation4 + $0x1], 0  ;;  %s1979_s12 = smov 0   ;;  %s1981_s13 = smov 0  }
   0x5   :  { %s1983_s14 = smov 0   ;;  %s1985_s15 = smov 0  }
   0x6 LB: > { %s2000_s16 = sadd.s32 4294967295, %s1948_s15   ;;  %s1244_s17 = sadd.s32 4294967294, %s1948_s15   ;;  %s1948_s15 = sphi %s1985_s15, %s2472_s15   ;;  %s1944_s14 = sphi %s1983_s14, %s2471_s14   ;;  %s1940_s13 = sphi %s1981_s13, %s2470_s13   ;;  %s1936_s12 = sphi %s1979_s12, %s2469_s12  }
   0x7   : > { %p40_p0 = scmp.ne.s32.totalorder %s1940_s13, %s1936_s12  ;;  %p2454_p1 = scmp.eq.s32.totalorder %s2000_s16, 0 }
   0x8   : > { %p112_p3 = scmp.eq.s32.totalorder %s1244_s17, 3  ;;  %p1245_p5 = scmp.ge.s32.totalorder %s1948_s15, 1 }
   0x9   : > { %p2009_p4 = por %p2454_p1, %p40_p0  ;;  %p119_p7 = scmp.lt.s32.totalorder %s1948_s15, 5 }
   0xa   : > { %p2014_p6 = por %p112_p3, %p40_p0  ;;  %s1950_s21 = smov [#allocation5]  }
   0xb   : > { %s2457_s18 = scalar_select %p2009_p4, 1, 0 }
   0xc   : > { %s2458_s19 = scalar_select %p2014_p6, 1, 0 }
   0xd   : > { %p2019_p8 = pnand %p1245_p5, %p119_p7  ;;  %s131_s22 = sshll.u32 %s1950_s21, 4  ;;  %s132_s22 = int_to_ptr.vmem [resolvable:$true] %s131_s22 }
   0xe   : > { %s2032_s24 = sadd.s32 1, %s1948_s15   ;;  %s27_s25 = sadd.s32 1, %s1944_s14 }
   0xf   : > { %s2459_s20 = scalar_select %p2019_p8, 1, 0 }
  0x10   : > { %p1531_p9 = pneg %p2019_p8  ;;  %s24_s26 = ssub.s32 %s1948_s15, %s2032_s24 }
  0x11   : > { %s1820_s29 = scalar_lea.hbm %s2451_s1, 3072 }
  0x12   : > { %p2027_p10 = pnand %p1531_p9, %p2454_p1  ;;  %p1821_p11 = scmp.ne.s32.totalorder %s2451_s1, %s1820_s29 }
  0x13   : > { %p1827_p3 = scmp.lt.u32.totalorder %s1820_s29, %s2451_s1 }
  0x14   : > { %p1822_p12 = pneg %p2027_p10 }
  0x16   : > { %p1823_p13 = pnand %p1822_p12, %p1821_p11 }
  0x18   : > { %p1824_p0 = pneg %p1823_p13 }
  0x1a   : > { %p1829_p5 = pnand %p1827_p3, %p1824_p0 }
  0x1c   : > { %1832 = shalt.err (!%p1829_p5)
}
  0x1d   : > { %s1833_s7 = scalar_lea.vmem %s132_s22, 3072  ;;  %p1841_p2 = scmp.lt.s32.totalorder %s132_s22, %s132_s22 }
  0x1e   : > { %p1834_p7 = scmp.ne.s32.totalorder %s132_s22, %s1833_s7  ;;  %p1842_p6 = scmp.lt.s32.totalorder %s1833_s7, %s1833_s7 }
  0x20   : > { %p1836_p9 = pnand %p1834_p7, %p1822_p12  ;;  %p1843_p4 = por %p1842_p6, %p1841_p2 }
  0x22   : > { %p1837_p1 = pneg %p1836_p9 }
  0x24   : > { %p1844_p8 = pnand %p1843_p4, %p1837_p1 }
  0x26   : > { %1847 = shalt.err (!%p1844_p8)
}
  0x27   : > { %s1951_s8 = smov 64   ;;  %s1952_s9 = smov 4  }
  0x28   : > { %1534 = dma.hbm_to_vmem [thread:$0]  (!%p2027_p10), %s2451_s1, 3072, %s132_s22, [#allocation6], %s1951_s8, %s1951_s8, %s1952_s9  }
  0x29   : > { %p25_p11 = scmp.eq.s32.totalorder %s24_s26, 0  ;;  %p34_p2 = scmp.ne.s32.totalorder %s1944_s14, %s1940_s13 }
  0x2a   : > { %p35_p1 = scmp.eq.s32.totalorder %s1948_s15, 0  ;;  %p1544_p4 = scmp.lt.s32.totalorder %s1948_s15, 4 }
  0x2b   : > { %s2058_s17 = scalar_select %p25_p11, %s1944_s14, %s27_s25  }
  0x2c   : > { %p36_p6 = por %p35_p1, %p34_p2  ;;  %p2461_p8 = scmp.eq.s32.totalorder %s2000_s16, 3 }
  0x2d   : > { %s148_s27 = sand.u32 1, %s1944_s14   ;;  %s1289_s28 = sshll.u32 %s1948_s15, 12 }
  0x2e   : > { %p2062_p12 = por %p2461_p8, %p34_p2  ;;  %s1248_s29 = sshll.u32 %s148_s27, 8 }
  0x2f   : > { %s2071_s4 = scalar_lea.hbm %s2450_s0, %s1289_s28  ;;  %s152_s22 = scalar_lea.vmem [#allocation2], %s1248_s29 }
  0x30   : > { %s159_s25 = sshll.u32 %s152_s22, 4  ;;  %p2073_p10 = pnand %p1544_p4, %p36_p6  ;;  %s2077_s25 = int_to_ptr.vmem [resolvable:$true] %s159_s25 }
  0x31   : > { %s2079_s5 = scalar_lea.sflag [#allocation3], %s148_s27  ;;  %s1848_s6 = scalar_lea.hbm %s2071_s4, 4096 }
  0x32   : > { %p1849_p13 = scmp.ne.s32.totalorder %s2071_s4, %s1848_s6  ;;  %p1850_p0 = pneg %p2073_p10 }
  0x33   : > { %s1853_s9 = scalar_lea.hbm %s2450_s0, 16384  ;;  %p1854_p7 = scmp.lt.u32.totalorder %s2071_s4, %s2450_s0 }
  0x34   : > { %p1851_p3 = pnand %p1850_p0, %p1849_p13  ;;  %p1855_p9 = scmp.lt.u32.totalorder %s1853_s9, %s1848_s6 }
  0x35   : > { %p1857_p2 = scmp.lt.u32.totalorder %s1848_s6, %s2071_s4 }
  0x36   : > { %p1852_p5 = pneg %p1851_p3  ;;  %p1856_p11 = por %p1855_p9, %p1854_p7 }
  0x38   : > { %p1858_p1 = por %p1857_p2, %p1856_p11 }
  0x3a   : > { %p1859_p4 = pnand %p1858_p1, %p1852_p5 }
  0x3c   : > { %1862 = shalt.err (!%p1859_p4)
}
  0x3d   : > { %s1863_s27 = scalar_lea.vmem %s2077_s25, 4096  ;;  %s1953_s28 = smov [#allocation2]  }
  0x3e   : > { %p1864_p6 = scmp.ne.s32.totalorder %s2077_s25, %s1863_s27  ;;  %s1868_s29 = sshll.u32 %s1953_s28, 4  ;;  %s1869_s29 = int_to_ptr.vmem [resolvable:$false] %s1868_s29 }
  0x3f   : > { %s1870_s23 = scalar_lea.vmem %s1869_s29, 8192  ;;  %p1871_p3 = scmp.lt.s32.totalorder %s2077_s25, %s1869_s29 }
  0x40   : > { %p1866_p8 = pnand %p1864_p6, %p1850_p0  ;;  %p1872_p7 = scmp.lt.s32.totalorder %s1870_s23, %s1863_s27 }
  0x42   : > { %p1867_p13 = pneg %p1866_p8  ;;  %p1873_p9 = por %p1872_p7, %p1871_p3 }
  0x44   : > { %p1874_p11 = pnand %p1873_p9, %p1867_p13 }
  0x46   : > { %1877 = shalt.err (!%p1874_p11)
}
  0x47   : > { %s1954_s30 = smov 128   ;;  %s1955_s22 = smov 8  }
  0x48   : > { %1538 = dma.hbm_to_vmem [thread:$0]  (!%p2073_p10), %s2071_s4, 4096, %s2077_s25, %s2079_s5, %s1954_s30, %s1954_s30, %s1955_s22  }
  0x49   : > { %p2464_p0 = scmp.ne.s32.totalorder %s2459_s20, 0 }
  0x4a   : > { %s2110_s6 = sand.u32 (!%p2464_p0), 1, %s1940_s13   ;;  %p2465_p5 = scmp.ne.s32.totalorder (!%p2464_p0), %s2457_s18, 0 }
  0x4b   : > { %171 = sbr.rel (%p2464_p0) target bundleno = 884 (0x374), region = 32  ;;  %s1252_s7 = sshll.u32 (!%p2464_p0), %s2110_s6, 8 }
  0x4c   : > { %s174_s8 = scalar_lea.sflag (!%p2464_p0), [#allocation3], %s2110_s6  ;;  %s2116_s9 = scalar_lea.vmem (!%p2464_p0), [#allocation2], %s1252_s7 }
  0x52   : > { %1923 = dma.done.wait (%p2465_p5), %s174_s8, 4096  }
  0x53   : > { %1925 = vsyncadd (%p2465_p5), %s174_s8, 4294963200  ;;  %p2466_p10 = scmp.eq.s32.totalorder %s2000_s16, 0 }
  0x55   : > { %1927 = dma.done.wait (%p2466_p10), [#allocation6], 3072   ;;  %p2467_p2 = pmov %p2466_p10 }
  0x56   : > { %v1586_v0 = vld [vmem:[#allocation5] sm:$0xff]   ;;  %v1587_v1 = vld [vmem:[#allocation5 + $0x8] sm:$0xff]   ;;  %v1588_v2 = vld [vmem:[#allocation5 + $0x10] sm:$0xff]   ;;  %s2312_s10 = scalar_lea.vmem [#allocation7], %s1252_s7  ;;  %s1290_s11 = sshll.u32 %s2000_s16, 12 }
  0x57   : > { %1929 = vsyncadd (%p2467_p2), [#allocation6], 4294964224  ;;  %1363 = vmatprep.subr.bf16.mxu0 %v1586_v0  ;;  %1507 = vmatprep.subr.bf16.mxu1 %v1586_v0  ;;  %v1589_v3 = vld [vmem:[#allocation5 + $0x18] sm:$0xff]   ;;  %v207_v4 = vld [vmem:[%s2116_s9] sm:$0xff]  ;;  %s1161_s27 = sshll.u32 %s2312_s10, 4  ;;  %s2401_s23 = scalar_lea.hbm %s2453_s3, %s1290_s11  ;;  %s2403_s27 = int_to_ptr.vmem [resolvable:$true] %s1161_s27 }
  0x58   : > { %1364 = vmatpush3.bf16.msra.mxu0 %v1586_v0  ;;  %1515 = vmatpush3.bf16.msra.mxu1 %v1586_v0  ;;  %v208_v5 = vld [vmem:[%s2116_s9 + $0x8] sm:$0xff]  ;;  %v1590_v7 = vld [vmem:[#allocation5 + $0x20] sm:$0xff]   ;;  %v1592_v12 = vld [vmem:[#allocation5 + $0x30] sm:$0xff]   ;;  %s1148_s16 = scalar_lea.sflag [#allocation4], %s2110_s6  ;;  %s1878_s30 = scalar_lea.vmem %s2403_s27, 4096 }
  0x59   : > { %1365 = vmatprep.subr.bf16.mxu0 %v1587_v1  ;;  %1508 = vmatprep.subr.bf16.mxu1 %v1587_v1  ;;  %v239_v6 = vpack.c.bf16 %v208_v5, %v207_v4  ;;  %v223_v8 = vld [vmem:[%s2116_s9 + $0x80] sm:$0xff]  ;;  %v224_v9 = vld [vmem:[%s2116_s9 + $0x88] sm:$0xff]  ;;  %v1593_v13 = vld [vmem:[#allocation5 + $0x38] sm:$0xff]   ;;  %p1879_p1 = scmp.ne.s32.totalorder %s2403_s27, %s1878_s30  ;;  %s1956_s22 = smov [#allocation7]  }
  0x5a   : > { %v247_v10 = vpack.c.bf16 %v224_v9, %v223_v8  ;;  %v1591_v11 = vld [vmem:[#allocation5 + $0x28] sm:$0xff]   ;;  %v2131_v14 = vld [vmem:[%s2116_s9 + $0x10] sm:$0xff]  ;;  %v2134_v15 = vld [vmem:[%s2116_s9 + $0x18] sm:$0xff]  ;;  %s1882_s7 = sshll.u32 %s1956_s22, 4  ;;  %s1883_s7 = int_to_ptr.vmem [resolvable:$false] %s1882_s7 }
  0x5b   : > { %1379 = vmatprep.mubr.bf16.mxu0 %v239_v6  ;;  %v2137_v16 = vld [vmem:[%s2116_s9 + $0x20] sm:$0xff]  ;;  %v2140_v17 = vld [vmem:[%s2116_s9 + $0x28] sm:$0xff]  ;;  %v225_v18 = vld [vmem:[%s2116_s9 + $0x90] sm:$0xff]  ;;  %v240_v23 = vpack.c.bf16 %v2134_v15, %v2131_v14  ;;  %p1880_p4 = pnand %p1879_p1, %p2062_p12  ;;  %s1884_s8 = scalar_lea.vmem %s1883_s7, 8192 }
  0x5c   : > { %1366 = vmatpush3.bf16.msra.mxu0 %v1587_v1  ;;  %1516 = vmatpush3.bf16.msra.mxu1 %v1587_v1  ;;  %v226_v19 = vld [vmem:[%s2116_s9 + $0x98] sm:$0xff]  ;;  %v227_v20 = vld [vmem:[%s2116_s9 + $0xa0] sm:$0xff]  ;;  %v228_v21 = vld [vmem:[%s2116_s9 + $0xa8] sm:$0xff]  ;;  %v241_v24 = vpack.c.bf16 %v2140_v17, %v2137_v16  ;;  %p1885_p8 = scmp.lt.s32.totalorder %s2403_s27, %s1883_s7  ;;  %p1886_p13 = scmp.lt.s32.totalorder %s1884_s8, %s1878_s30 }
  0x5d   : > { %1367 = vmatprep.subr.bf16.mxu0 %v1588_v2  ;;  %1509 = vmatprep.subr.bf16.mxu1 %v1588_v2  ;;  %v1594_v22 = vld [vmem:[#allocation5 + $0x40] sm:$0xff]   ;;  %v248_v25 = vpack.c.bf16 %v226_v19, %v225_v18  ;;  %v249_v26 = vpack.c.bf16 %v228_v21, %v227_v20  ;;  %v1595_v27 = vld [vmem:[#allocation5 + $0x48] sm:$0xff]   ;;  %v2151_v28 = vld [vmem:[%s2116_s9 + $0x30] sm:$0xff]  ;;  %p1881_p6 = pneg %p1880_p4 }
  0x5e   : > { %1395 = vmatprep.mubr.bf16.mxu1 %v247_v10  ;;  %v2154_v29 = vld [vmem:[%s2116_s9 + $0x38] sm:$0xff]  ;;  %v2157_v30 = vld [vmem:[%s2116_s9 + $0x40] sm:$0xff]  ;;  %v2160_v31 = vld [vmem:[%s2116_s9 + $0x48] sm:$0xff]  ;;  %p1887_p3 = por %p1886_p13, %p1885_p8 }
  0x5f   : > { %v229_v32 = vld [vmem:[%s2116_s9 + $0xb0] sm:$0xff]  ;;  %v230_v33 = vld [vmem:[%s2116_s9 + $0xb8] sm:$0xff]  ;;  %v231_v34 = vld [vmem:[%s2116_s9 + $0xc0] sm:$0xff]  ;;  %v242_v37 = vpack.c.bf16 %v2154_v29, %v2151_v28  ;;  %v243_v38 = vpack.c.bf16 %v2160_v31, %v2157_v30 }
  0x60   : > { %1368 = vmatpush3.bf16.msra.mxu0 %v1588_v2  ;;  %1517 = vmatpush3.bf16.msra.mxu1 %v1588_v2  ;;  %v232_v35 = vld [vmem:[%s2116_s9 + $0xc8] sm:$0xff]  ;;  %v1596_v36 = vld [vmem:[#allocation5 + $0x50] sm:$0xff]   ;;  %v250_v39 = vpack.c.bf16 %v230_v33, %v229_v32  ;;  %v1597_v41 = vld [vmem:[#allocation5 + $0x58] sm:$0xff]   ;;  %p1888_p7 = pnand %p1887_p3, %p1881_p6 }
  0x61   : > { %1369 = vmatprep.subr.bf16.mxu0 %v1589_v3  ;;  %1510 = vmatprep.subr.bf16.mxu1 %v1589_v3  ;;  %v251_v40 = vpack.c.bf16 %v232_v35, %v231_v34  ;;  %v2171_v42 = vld [vmem:[%s2116_s9 + $0x50] sm:$0xff]  ;;  %v2174_v43 = vld [vmem:[%s2116_s9 + $0x58] sm:$0xff]  ;;  %v2177_v44 = vld [vmem:[%s2116_s9 + $0x60] sm:$0xff] }
  0x62   : > { %v2180_v45 = vld [vmem:[%s2116_s9 + $0x68] sm:$0xff]  ;;  %v233_v46 = vld [vmem:[%s2116_s9 + $0xd0] sm:$0xff]  ;;  %v234_v47 = vld [vmem:[%s2116_s9 + $0xd8] sm:$0xff]  ;;  %v244_v50 = vpack.c.bf16 %v2174_v43, %v2171_v42 }
  0x63   : > { %v235_v48 = vld [vmem:[%s2116_s9 + $0xe0] sm:$0xff]  ;;  %v236_v49 = vld [vmem:[%s2116_s9 + $0xe8] sm:$0xff]  ;;  %v245_v51 = vpack.c.bf16 %v2180_v45, %v2177_v44  ;;  %v252_v52 = vpack.c.bf16 %v234_v47, %v233_v46  ;;  %v2191_v54 = vld [vmem:[%s2116_s9 + $0x70] sm:$0xff] }
  0x64   : > { %1370 = vmatpush3.bf16.msra.mxu0 %v1589_v3  ;;  %1518 = vmatpush3.bf16.msra.mxu1 %v1589_v3  ;;  %v253_v53 = vpack.c.bf16 %v236_v49, %v235_v48  ;;  %v2194_v55 = vld [vmem:[%s2116_s9 + $0x78] sm:$0xff]  ;;  %v237_v56 = vld [vmem:[%s2116_s9 + $0xf0] sm:$0xff]  ;;  %v1598_v60 = vld [vmem:[#allocation5 + $0x60] sm:$0xff]  }
  0x65   : > { %1371 = vmatprep.subr.bf16.mxu0 %v1590_v7  ;;  %1511 = vmatprep.subr.bf16.mxu1 %v1590_v7  ;;  %v238_v57 = vld [vmem:[%s2116_s9 + $0xf8] sm:$0xff]  ;;  %v246_v58 = vpack.c.bf16 %v2194_v55, %v2191_v54  ;;  %v1599_v61 = vld [vmem:[#allocation5 + $0x68] sm:$0xff]   ;;  %v1600_v62 = vld [vmem:[#allocation5 + $0x70] sm:$0xff]  }
  0x66   : > { %v254_v59 = vpack.c.bf16 %v238_v57, %v237_v56  ;;  %v1601_v63 = vld [vmem:[#allocation5 + $0x78] sm:$0xff]   ;;  %v1602_v0 = vld [vmem:[#allocation5 + $0x80] sm:$0xff]   ;;  %v1603_v1 = vld [vmem:[#allocation5 + $0x88] sm:$0xff]  }
  0x67   : > { %v1604_v2 = vld [vmem:[#allocation5 + $0x90] sm:$0xff]   ;;  %v1605_v3 = vld [vmem:[#allocation5 + $0x98] sm:$0xff]   ;;  %v2203_v4 = vld [vmem:[%s2452_s2] ss:$0 sm:$0xff] }
  0x68   : > { %1372 = vmatpush3.bf16.msra.mxu0 %v1590_v7  ;;  %1519 = vmatpush3.bf16.msra.mxu1 %v1590_v7 }
  0x69   : > { %1373 = vmatprep.subr.bf16.mxu0 %v1591_v11  ;;  %1512 = vmatprep.subr.bf16.mxu1 %v1591_v11 }
  0x6c   : > { %1374 = vmatpush3.bf16.msra.mxu0 %v1591_v11  ;;  %1520 = vmatpush3.bf16.msra.mxu1 %v1591_v11 }
  0x6d   : > { %1375 = vmatprep.subr.bf16.mxu0 %v1592_v12  ;;  %1513 = vmatprep.subr.bf16.mxu1 %v1592_v12 }
  0x70   : > { %1376 = vmatpush3.bf16.msra.mxu0 %v1592_v12  ;;  %1521 = vmatpush3.bf16.msra.mxu1 %v1592_v12 }
  0x71   : > { %1377 = vmatprep.subr.bf16.mxu0 %v1593_v13  ;;  %1514 = vmatprep.subr.bf16.mxu1 %v1593_v13 }
  0x74   : > { %1378 = vmatpush3.bf16.msra.mxu0 %v1593_v13  ;;  %1522 = vmatpush3.bf16.msra.mxu1 %v1593_v13 }
  0x75   : > { %1411 = vmatprep.subr.bf16.mxu1 %v1594_v22  ;;  %1459 = vmatprep.subr.bf16.mxu0 %v1602_v0 }
  0x77   : > { %1380 = vmatmul.mubr.bf16.vlgmr.msra.gmra.mrb[0].mxu0 %v240_v23  ;;  %1396 = vmatmul.mubr.bf16.vlgmr.msra.gmra.mrb[0].mxu1 %v248_v25 }
  0x78   : > { %1383 = vmatprep.mubr.bf16.mxu0 %v241_v24  ;;  %1399 = vmatprep.mubr.bf16.mxu1 %v249_v26 }
  0x79   : > { %1412 = vmatpush3.bf16.msra.mxu1 %v1594_v22  ;;  %1460 = vmatpush3.bf16.msra.mxu0 %v1602_v0 }
  0x7a   : > { %1413 = vmatprep.subr.bf16.mxu1 %v1595_v27  ;;  %1461 = vmatprep.subr.bf16.mxu0 %v1603_v1 }
  0x7d   : > { %1414 = vmatpush3.bf16.msra.mxu1 %v1595_v27  ;;  %1462 = vmatpush3.bf16.msra.mxu0 %v1603_v1 }
  0x7e   : > { %1415 = vmatprep.subr.bf16.mxu1 %v1596_v36  ;;  %1463 = vmatprep.subr.bf16.mxu0 %v1604_v2 }
  0x7f   : > { %1384 = vmatmul.mubr.bf16.gmra.mrb[4].mxu0 %v242_v37  ;;  %1400 = vmatmul.mubr.bf16.gmra.mrb[4].mxu1 %v250_v39 }
  0x80   : > { %1387 = vmatprep.mubr.bf16.mxu0 %v243_v38  ;;  %1403 = vmatprep.mubr.bf16.mxu1 %v251_v40 }
  0x81   : > { %1416 = vmatpush3.bf16.msra.mxu1 %v1596_v36  ;;  %1464 = vmatpush3.bf16.msra.mxu0 %v1604_v2 }
  0x82   : > { %1417 = vmatprep.subr.bf16.mxu1 %v1597_v41  ;;  %1465 = vmatprep.subr.bf16.mxu0 %v1605_v3 }
  0x85   : > { %1418 = vmatpush3.bf16.msra.mxu1 %v1597_v41  ;;  %1466 = vmatpush3.bf16.msra.mxu0 %v1605_v3 }
  0x86   : > { %1419 = vmatprep.subr.bf16.mxu1 %v1598_v60 }
  0x87   : > { %1388 = vmatmul.mubr.bf16.gmra.mrb[8].mxu0 %v244_v50  ;;  %1404 = vmatmul.mubr.bf16.gmra.mrb[8].mxu1 %v252_v52 }
  0x88   : > { %1391 = vmatprep.mubr.bf16.mxu0 %v245_v51  ;;  %1407 = vmatprep.mubr.bf16.mxu1 %v253_v53 }
  0x89   : > { %1420 = vmatpush3.bf16.msra.mxu1 %v1598_v60 }
  0x8a   : > { %1421 = vmatprep.subr.bf16.mxu1 %v1599_v61 }
  0x8d   : > { %1422 = vmatpush3.bf16.msra.mxu1 %v1599_v61 }
  0x8e   : > { %1423 = vmatprep.subr.bf16.mxu1 %v1600_v62 }
  0x8f   : > { %1392 = vmatmul.mubr.bf16.gmra.mrb[12].mxu0 %v246_v58  ;;  %1408 = vmatmul.mubr.bf16.gmra.mrb[12].mxu1 %v254_v59 }
  0x91   : > { %1424 = vmatpush3.bf16.msra.mxu1 %v1600_v62 }
  0x92   : > { %1425 = vmatprep.subr.bf16.mxu1 %v1601_v63 }
  0x95   : > { %1426 = vmatpush3.bf16.msra.mxu1 %v1601_v63 }
 0x14a   : > { %v1381_v5 = vpop.f32.mrb[0].mxu0  ;;  %v1397_v8 = vpop.f32.mrb[0].mxu1 }
 0x14b   : > { %v369_v6 = vadd.f32 %v1381_v5, %v2203_v4  ;;  %v360_v7 = vpop.f32.mrb[1].mxu0  ;;  %v424_v11 = vpop.f32.mrb[1].mxu1  ;;  %v433_v18 = vadd.f32 %v1397_v8, %v2203_v4 }
 0x14c   : > { %v361_v9 = vadd.f32 %v2203_v4, %v360_v7  ;;  %v1382_v10 = vpop.f32.mrb[2].mxu0  ;;  %v1398_v19 = vpop.f32.mrb[2].mxu1  ;;  %v425_v21 = vadd.f32 %v2203_v4, %v424_v11 }
 0x14d   : > { %1610 = vtanh.f32 %v369_v6  ;;  %v372_v12 = vadd.f32 %v1382_v10, %v2203_v4  ;;  %v363_v13 = vpop.f32.mrb[3].mxu0  ;;  %v427_v22 = vpop.f32.mrb[3].mxu1  ;;  %v436_v23 = vadd.f32 %v1398_v19, %v2203_v4 }
 0x14e   : > { %1612 = vtanh.f32 %v361_v9  ;;  %v364_v20 = vadd.f32 %v2203_v4, %v363_v13  ;;  %v428_v24 = vadd.f32 %v2203_v4, %v427_v22 }
 0x14f   : > { %1614 = vtanh.f32 %v372_v12 }
 0x150   : > { %1616 = vtanh.f32 %v364_v20 }
 0x151   : > { %1618 = vtanh.f32 %v433_v18 }
 0x152   : > { %v1385_v25 = vpop.f32.mrb[4].mxu0  ;;  %1620 = vtanh.f32 %v425_v21  ;;  %v1401_v32 = vpop.f32.mrb[4].mxu1 }
 0x153   : > { %v385_v26 = vadd.f32 %v1385_v25, %v2203_v4  ;;  %v376_v27 = vpop.f32.mrb[5].mxu0  ;;  %1622 = vtanh.f32 %v436_v23  ;;  %v440_v35 = vpop.f32.mrb[5].mxu1  ;;  %v449_v38 = vadd.f32 %v1401_v32, %v2203_v4 }
 0x154   : > { %v377_v33 = vadd.f32 %v2203_v4, %v376_v27  ;;  %v1386_v34 = vpop.f32.mrb[6].mxu0  ;;  %1624 = vtanh.f32 %v428_v24  ;;  %v1402_v39 = vpop.f32.mrb[6].mxu1  ;;  %v441_v41 = vadd.f32 %v2203_v4, %v440_v35 }
 0x155   : > { %1626 = vtanh.f32 %v385_v26  ;;  %v388_v36 = vadd.f32 %v1386_v34, %v2203_v4  ;;  %v379_v37 = vpop.f32.mrb[7].mxu0  ;;  %v443_v46 = vpop.f32.mrb[7].mxu1  ;;  %v452_v48 = vadd.f32 %v1402_v39, %v2203_v4 }
 0x156   : > { %1628 = vtanh.f32 %v377_v33  ;;  %v380_v40 = vadd.f32 %v2203_v4, %v379_v37  ;;  %v444_v50 = vadd.f32 %v2203_v4, %v443_v46 }
 0x157   : > { %v1611_v47 = vpop.eup %1610  ;;  %1630 = vtanh.f32 %v388_v36 }
 0x158   : > { %v1613_v49 = vpop.eup %1612  ;;  %1632 = vtanh.f32 %v380_v40 }
 0x159   : > { %v1615_v51 = vpop.eup %1614  ;;  %1634 = vtanh.f32 %v449_v38 }
 0x15a   : > { %v1617_v52 = vpop.eup %1616  ;;  %v1389_v53 = vpop.f32.mrb[8].mxu0  ;;  %v520_v56 = vpack.c.bf16 %v1615_v51, %v1611_v47  ;;  %1636 = vtanh.f32 %v441_v41 }
 0x15b   : > { %v2221_v57 = vpop.eup %1618  ;;  %v401_v58 = vadd.f32 %v1389_v53, %v2203_v4  ;;  %v392_v59 = vpop.f32.mrb[9].mxu0  ;;  %v519_v60 = vpack.c.bf16 %v1617_v52, %v1613_v49  ;;  %1638 = vtanh.f32 %v452_v48 }
 0x15c   : > { %v1405_v61 = vpop.f32.mrb[8].mxu1  ;;  %v2224_v62 = vpop.eup %1620  ;;  %v393_v63 = vadd.f32 %v2203_v4, %v392_v59  ;;  %1640 = vtanh.f32 %v444_v50 }
 0x15d   : > { %v1390_v0 = vpop.f32.mrb[10].mxu0  ;;  %v456_v1 = vpop.f32.mrb[9].mxu1  ;;  %1642 = vtanh.f32 %v401_v58  ;;  %1427 = vmatprep.mubr.bf16.mxu1 %v519_v60  ;;  %v465_v6 = vadd.f32 %v1405_v61, %v2203_v4 }
 0x15e   : > { %v2227_v2 = vpop.eup %1622  ;;  %v404_v3 = vadd.f32 %v1390_v0, %v2203_v4  ;;  %v395_v5 = vpop.f32.mrb[11].mxu0  ;;  %1644 = vtanh.f32 %v393_v63  ;;  %1428 = vmatmul.mubr.bf16.vlgmr.msra.gmra.mrb[16].mxu1 %v520_v56  ;;  %v457_v10 = vadd.f32 %v2203_v4, %v456_v1 }
 0x15f   : > { %v1406_v7 = vpop.f32.mrb[10].mxu1  ;;  %v2231_v8 = vpop.eup %1624  ;;  %v396_v9 = vadd.f32 %v2203_v4, %v395_v5  ;;  %v528_v12 = vpack.c.bf16 %v2227_v2, %v2221_v57  ;;  %v2261_v57 = vld [vmem:[%s2452_s2 + $0x1] ss:$0 sm:$0xff] }
 0x160   : > { %v459_v11 = vpop.f32.mrb[11].mxu1  ;;  %v1627_v13 = vpop.eup %1626  ;;  %1646 = vtanh.f32 %v404_v3  ;;  %v468_v18 = vadd.f32 %v1406_v7, %v2203_v4  ;;  %v527_v19 = vpack.c.bf16 %v2231_v8, %v2224_v62  ;;  %v1609_v62 = vld [vmem:[#allocation5 + $0xb8] sm:$0xff]  }
 0x161   : > { %v1629_v20 = vpop.eup %1628  ;;  %1648 = vtanh.f32 %v396_v9  ;;  %v460_v21 = vadd.f32 %v2203_v4, %v459_v11 }
 0x162   : > { %v1631_v22 = vpop.eup %1630  ;;  %1650 = vtanh.f32 %v465_v6  ;;  %v1393_v24 = vpop.f32.mrb[12].mxu0 }
 0x163   : > { %v1633_v23 = vpop.eup %1632  ;;  %v522_v25 = vpack.c.bf16 %v1631_v22, %v1627_v13  ;;  %1652 = vtanh.f32 %v457_v10  ;;  %v417_v27 = vadd.f32 %v1393_v24, %v2203_v4  ;;  %v408_v32 = vpop.f32.mrb[13].mxu0 }
 0x164   : > { %v2241_v26 = vpop.eup %1634  ;;  %v521_v33 = vpack.c.bf16 %v1633_v23, %v1629_v20  ;;  %1654 = vtanh.f32 %v468_v18  ;;  %v1409_v34 = vpop.f32.mrb[12].mxu1  ;;  %v409_v36 = vadd.f32 %v2203_v4, %v408_v32  ;;  %v1606_v32 = vld [vmem:[#allocation5 + $0xa0] sm:$0xff]  }
 0x165   : > { %v1637_v35 = vpop.eup %1636  ;;  %v1394_v37 = vpop.f32.mrb[14].mxu0  ;;  %1656 = vtanh.f32 %v460_v21  ;;  %v481_v46 = vadd.f32 %v1409_v34, %v2203_v4  ;;  %1467 = vmatprep.subr.bf16.mxu0 %v1606_v32  ;;  %v1608_v34 = vld [vmem:[#allocation5 + $0xb0] sm:$0xff]  }
 0x166   : > { %v472_v38 = vpop.f32.mrb[13].mxu1  ;;  %v1639_v39 = vpop.eup %1638  ;;  %1658 = vtanh.f32 %v417_v27  ;;  %v420_v40 = vadd.f32 %v1394_v37, %v2203_v4  ;;  %1431 = vmatprep.mubr.bf16.mxu1 %v521_v33  ;;  %1468 = vmatpush3.bf16.msra.mxu0 %v1606_v32  ;;  %v1607_v33 = vld [vmem:[#allocation5 + $0xa8] sm:$0xff]  }
 0x167   : > { %v411_v41 = vpop.f32.mrb[15].mxu0  ;;  %v1410_v47 = vpop.f32.mrb[14].mxu1  ;;  %1660 = vtanh.f32 %v409_v36  ;;  %1432 = vmatmul.mubr.bf16.gmra.mrb[20].mxu1 %v522_v25  ;;  %v473_v50 = vadd.f32 %v2203_v4, %v472_v38  ;;  %v530_v52 = vpack.c.bf16 %v1639_v39, %v2241_v26  ;;  %1469 = vmatprep.subr.bf16.mxu0 %v1607_v33 }
 0x168   : > { %v1641_v48 = vpop.eup %1640  ;;  %v412_v49 = vadd.f32 %v2203_v4, %v411_v41  ;;  %v475_v51 = vpop.f32.mrb[15].mxu1  ;;  %1662 = vtanh.f32 %v420_v40  ;;  %v484_v56 = vadd.f32 %v1410_v47, %v2203_v4 }
 0x169   : > { %v1643_v53 = vpop.eup %1642  ;;  %v529_v58 = vpack.c.bf16 %v1641_v48, %v1637_v35  ;;  %v476_v60 = vadd.f32 %v2203_v4, %v475_v51 }
 0x16a   : > { %v1645_v59 = vpop.eup %1644  ;;  %1664 = vtanh.f32 %v412_v49  ;;  %1470 = vmatpush3.bf16.msra.mxu0 %v1607_v33 }
 0x16b   : > { %v1647_v61 = vpop.eup %1646  ;;  %1666 = vtanh.f32 %v481_v46  ;;  %1471 = vmatprep.subr.bf16.mxu0 %v1608_v34 }
 0x16c   : > { %v1649_v63 = vpop.eup %1648  ;;  %v524_v0 = vpack.c.bf16 %v1647_v61, %v1643_v53  ;;  %1668 = vtanh.f32 %v473_v50 }
 0x16d   : > { %v1651_v1 = vpop.eup %1650  ;;  %v523_v3 = vpack.c.bf16 %v1649_v63, %v1645_v59  ;;  %1670 = vtanh.f32 %v484_v56 }
 0x16e   : > { %v1653_v5 = vpop.eup %1652  ;;  %1672 = vtanh.f32 %v476_v60  ;;  %1472 = vmatpush3.bf16.msra.mxu0 %v1608_v34 }
 0x16f   : > { %v1655_v6 = vpop.eup %1654  ;;  %1435 = vmatprep.mubr.bf16.mxu1 %v523_v3  ;;  %1473 = vmatprep.subr.bf16.mxu0 %v1609_v62 }
 0x170   : > { %v1657_v7 = vpop.eup %1656  ;;  %1436 = vmatmul.mubr.bf16.gmra.mrb[24].mxu1 %v524_v0  ;;  %v532_v9 = vpack.c.bf16 %v1655_v6, %v1651_v1 }
 0x171   : > { %v1659_v10 = vpop.eup %1658  ;;  %v531_v11 = vpack.c.bf16 %v1657_v7, %v1653_v5 }
 0x172   : > { %v1661_v13 = vpop.eup %1660  ;;  %1474 = vmatpush3.bf16.msra.mxu0 %v1609_v62 }
 0x173   : > { %v1663_v18 = vpop.eup %1662 }
 0x174   : > { %v1665_v4 = vpop.eup %1664  ;;  %v526_v20 = vpack.c.bf16 %v1663_v18, %v1659_v10 }
 0x175   : > { %v1667_v21 = vpop.eup %1666  ;;  %v525_v22 = vpack.c.bf16 %v1665_v4, %v1661_v13 }
 0x176   : > { %v1669_v23 = vpop.eup %1668 }
 0x177   : > { %v1671_v24 = vpop.eup %1670  ;;  %1439 = vmatprep.mubr.bf16.mxu1 %v525_v22 }
 0x178   : > { %v1673_v25 = vpop.eup %1672  ;;  %1440 = vmatmul.mubr.bf16.gmra.mrb[28].mxu1 %v526_v20  ;;  %v534_v26 = vpack.c.bf16 %v1671_v24, %v1667_v21 }
 0x179   : > { %1443 = vmatprep.mubr.bf16.mxu1 %v527_v19  ;;  %v533_v27 = vpack.c.bf16 %v1673_v25, %v1669_v23 }
 0x180   : > { %1444 = vmatmul.mubr.bf16.gmra.mrb[32].mxu1 %v528_v12 }
 0x181   : > { %1447 = vmatprep.mubr.bf16.mxu1 %v529_v58 }
 0x188   : > { %1448 = vmatmul.mubr.bf16.gmra.mrb[36].mxu1 %v530_v52 }
 0x189   : > { %1451 = vmatprep.mubr.bf16.mxu1 %v531_v11 }
 0x190   : > { %1452 = vmatmul.mubr.bf16.gmra.mrb[40].mxu1 %v532_v9 }
 0x191   : > { %1455 = vmatprep.mubr.bf16.mxu1 %v533_v27 }
 0x198   : > { %1456 = vmatmul.mubr.bf16.gmra.mrb[44].mxu1 %v534_v26 }
 0x231   : > { %v1429_v2 = vpop.f32.mrb[16].mxu1 }
 0x232   : > { %v651_v8 = vadd.f32 %v1429_v2, %v2261_v57  ;;  %v642_v12 = vpop.f32.mrb[17].mxu1 }
 0x233   : > { %v643_v19 = vadd.f32 %v2261_v57, %v642_v12  ;;  %v1430_v35 = vpop.f32.mrb[18].mxu1 }
 0x234   : > { %1674 = vtanh.f32 %v651_v8  ;;  %v654_v36 = vadd.f32 %v1430_v35, %v2261_v57  ;;  %v645_v37 = vpop.f32.mrb[19].mxu1 }
 0x235   : > { %1676 = vtanh.f32 %v643_v19  ;;  %v646_v38 = vadd.f32 %v2261_v57, %v645_v37 }
 0x236   : > { %1678 = vtanh.f32 %v654_v36 }
 0x237   : > { %1680 = vtanh.f32 %v646_v38 }
 0x23a   : > { %v1433_v39 = vpop.f32.mrb[20].mxu1 }
 0x23b   : > { %v667_v40 = vadd.f32 %v1433_v39, %v2261_v57  ;;  %v658_v41 = vpop.f32.mrb[21].mxu1 }
 0x23c   : > { %v659_v46 = vadd.f32 %v2261_v57, %v658_v41  ;;  %v1434_v47 = vpop.f32.mrb[22].mxu1 }
 0x23d   : > { %1682 = vtanh.f32 %v667_v40  ;;  %v670_v48 = vadd.f32 %v1434_v47, %v2261_v57  ;;  %v661_v49 = vpop.f32.mrb[23].mxu1 }
 0x23e   : > { %1684 = vtanh.f32 %v659_v46  ;;  %v662_v50 = vadd.f32 %v2261_v57, %v661_v49  ;;  %v1675_v51 = vpop.eup %1674 }
 0x23f   : > { %1686 = vtanh.f32 %v670_v48  ;;  %v1677_v52 = vpop.eup %1676 }
 0x240   : > { %1688 = vtanh.f32 %v662_v50  ;;  %v1679_v53 = vpop.eup %1678 }
 0x241   : > { %v1681_v56 = vpop.eup %1680  ;;  %v802_v59 = vpack.c.bf16 %v1679_v53, %v1675_v51 }
 0x242   : > { %v801_v63 = vpack.c.bf16 %v1681_v56, %v1677_v52 }
 0x243   : > { %v1437_v58 = vpop.f32.mrb[24].mxu1 }
 0x244   : > { %v683_v60 = vadd.f32 %v1437_v58, %v2261_v57  ;;  %v674_v61 = vpop.f32.mrb[25].mxu1  ;;  %1475 = vmatprep.mubr.bf16.mxu0 %v801_v63 }
 0x245   : > { %v675_v0 = vadd.f32 %v2261_v57, %v674_v61  ;;  %v1438_v1 = vpop.f32.mrb[26].mxu1  ;;  %1476 = vmatmul.mubr.bf16.vlgmr.msra.gmra.mrb[16].mxu0 %v802_v59 }
 0x246   : > { %1690 = vtanh.f32 %v683_v60  ;;  %v686_v3 = vadd.f32 %v1438_v1, %v2261_v57  ;;  %v677_v5 = vpop.f32.mrb[27].mxu1 }
 0x247   : > { %1692 = vtanh.f32 %v675_v0  ;;  %v678_v6 = vadd.f32 %v2261_v57, %v677_v5  ;;  %v1683_v7 = vpop.eup %1682 }
 0x248   : > { %1694 = vtanh.f32 %v686_v3  ;;  %v1685_v9 = vpop.eup %1684 }
 0x249   : > { %1696 = vtanh.f32 %v678_v6  ;;  %v1687_v10 = vpop.eup %1686 }
 0x24a   : > { %v1689_v11 = vpop.eup %1688  ;;  %v804_v18 = vpack.c.bf16 %v1687_v10, %v1683_v7 }
 0x24b   : > { %v1441_v13 = vpop.f32.mrb[28].mxu1  ;;  %v803_v21 = vpack.c.bf16 %v1689_v11, %v1685_v9 }
 0x24c   : > { %v699_v4 = vadd.f32 %v1441_v13, %v2261_v57  ;;  %v690_v20 = vpop.f32.mrb[29].mxu1 }
 0x24d   : > { %v691_v22 = vadd.f32 %v2261_v57, %v690_v20  ;;  %v1442_v23 = vpop.f32.mrb[30].mxu1  ;;  %1479 = vmatprep.mubr.bf16.mxu0 %v803_v21 }
 0x24e   : > { %1698 = vtanh.f32 %v699_v4  ;;  %v702_v24 = vadd.f32 %v1442_v23, %v2261_v57  ;;  %v693_v25 = vpop.f32.mrb[31].mxu1  ;;  %1480 = vmatmul.mubr.bf16.gmra.mrb[20].mxu0 %v804_v18 }
 0x24f   : > { %1700 = vtanh.f32 %v691_v22  ;;  %v694_v26 = vadd.f32 %v2261_v57, %v693_v25 }
 0x250   : > { %v1691_v27 = vpop.eup %1690  ;;  %1702 = vtanh.f32 %v702_v24 }
 0x251   : > { %v1693_v32 = vpop.eup %1692  ;;  %1704 = vtanh.f32 %v694_v26 }
 0x252   : > { %v1695_v33 = vpop.eup %1694 }
 0x253   : > { %v1697_v34 = vpop.eup %1696  ;;  %v1445_v62 = vpop.f32.mrb[32].mxu1  ;;  %v806_v2 = vpack.c.bf16 %v1695_v33, %v1691_v27 }
 0x254   : > { %v715_v8 = vadd.f32 %v1445_v62, %v2261_v57  ;;  %v706_v12 = vpop.f32.mrb[33].mxu1  ;;  %v805_v19 = vpack.c.bf16 %v1697_v34, %v1693_v32 }
 0x255   : > { %v707_v35 = vadd.f32 %v2261_v57, %v706_v12  ;;  %v1446_v36 = vpop.f32.mrb[34].mxu1 }
 0x256   : > { %1706 = vtanh.f32 %v715_v8  ;;  %v718_v37 = vadd.f32 %v1446_v36, %v2261_v57  ;;  %v709_v38 = vpop.f32.mrb[35].mxu1  ;;  %1483 = vmatprep.mubr.bf16.mxu0 %v805_v19 }
 0x257   : > { %1708 = vtanh.f32 %v707_v35  ;;  %v710_v39 = vadd.f32 %v2261_v57, %v709_v38  ;;  %1484 = vmatmul.mubr.bf16.gmra.mrb[24].mxu0 %v806_v2 }
 0x258   : > { %v1699_v40 = vpop.eup %1698  ;;  %1710 = vtanh.f32 %v718_v37 }
 0x259   : > { %v1701_v41 = vpop.eup %1700  ;;  %1712 = vtanh.f32 %v710_v39 }
 0x25a   : > { %v1703_v46 = vpop.eup %1702 }
 0x25b   : > { %v1705_v47 = vpop.eup %1704  ;;  %v1449_v48 = vpop.f32.mrb[36].mxu1  ;;  %v808_v49 = vpack.c.bf16 %v1703_v46, %v1699_v40 }
 0x25c   : > { %v731_v50 = vadd.f32 %v1449_v48, %v2261_v57  ;;  %v722_v51 = vpop.f32.mrb[37].mxu1  ;;  %v807_v52 = vpack.c.bf16 %v1705_v47, %v1701_v41 }
 0x25d   : > { %v723_v53 = vadd.f32 %v2261_v57, %v722_v51  ;;  %v1450_v56 = vpop.f32.mrb[38].mxu1 }
 0x25e   : > { %1714 = vtanh.f32 %v731_v50  ;;  %v734_v58 = vadd.f32 %v1450_v56, %v2261_v57  ;;  %v725_v59 = vpop.f32.mrb[39].mxu1  ;;  %1487 = vmatprep.mubr.bf16.mxu0 %v807_v52 }
 0x25f   : > { %1716 = vtanh.f32 %v723_v53  ;;  %v726_v60 = vadd.f32 %v2261_v57, %v725_v59  ;;  %1488 = vmatmul.mubr.bf16.gmra.mrb[28].mxu0 %v808_v49 }
 0x260   : > { %v1707_v61 = vpop.eup %1706  ;;  %1718 = vtanh.f32 %v734_v58 }
 0x261   : > { %v1709_v63 = vpop.eup %1708  ;;  %1720 = vtanh.f32 %v726_v60 }
 0x262   : > { %v1711_v0 = vpop.eup %1710 }
 0x263   : > { %v1713_v1 = vpop.eup %1712  ;;  %v1453_v3 = vpop.f32.mrb[40].mxu1  ;;  %v810_v5 = vpack.c.bf16 %v1711_v0, %v1707_v61 }
 0x264   : > { %v747_v6 = vadd.f32 %v1453_v3, %v2261_v57  ;;  %v738_v7 = vpop.f32.mrb[41].mxu1  ;;  %v809_v9 = vpack.c.bf16 %v1713_v1, %v1709_v63 }
 0x265   : > { %v739_v10 = vadd.f32 %v2261_v57, %v738_v7  ;;  %v1454_v11 = vpop.f32.mrb[42].mxu1 }
 0x266   : > { %1722 = vtanh.f32 %v747_v6  ;;  %v750_v13 = vadd.f32 %v1454_v11, %v2261_v57  ;;  %v741_v18 = vpop.f32.mrb[43].mxu1  ;;  %1491 = vmatprep.mubr.bf16.mxu0 %v809_v9 }
 0x267   : > { %1724 = vtanh.f32 %v739_v10  ;;  %v742_v4 = vadd.f32 %v2261_v57, %v741_v18  ;;  %1492 = vmatmul.mubr.bf16.gmra.mrb[32].mxu0 %v810_v5 }
 0x268   : > { %v1715_v20 = vpop.eup %1714  ;;  %1726 = vtanh.f32 %v750_v13  ;;  %v1802_v13 = vld [vmem:[%s2116_s9] sm:$0xff] }
 0x269   : > { %v1717_v21 = vpop.eup %1716  ;;  %1728 = vtanh.f32 %v742_v4 }
 0x26a   : > { %v1719_v22 = vpop.eup %1718 }
 0x26b   : > { %v1721_v23 = vpop.eup %1720  ;;  %v1457_v24 = vpop.f32.mrb[44].mxu1  ;;  %v812_v25 = vpack.c.bf16 %v1719_v22, %v1715_v20  ;;  %v1803_v22 = vld [vmem:[%s2116_s9 + $0x8] sm:$0xff] }
 0x26c   : > { %v763_v26 = vadd.f32 %v1457_v24, %v2261_v57  ;;  %v754_v27 = vpop.f32.mrb[45].mxu1  ;;  %v811_v32 = vpack.c.bf16 %v1721_v23, %v1717_v21 }
 0x26d   : > { %v755_v33 = vadd.f32 %v2261_v57, %v754_v27  ;;  %v1458_v34 = vpop.f32.mrb[46].mxu1 }
 0x26e   : > { %1730 = vtanh.f32 %v763_v26  ;;  %v766_v62 = vadd.f32 %v1458_v34, %v2261_v57  ;;  %v757_v2 = vpop.f32.mrb[47].mxu1  ;;  %1495 = vmatprep.mubr.bf16.mxu0 %v811_v32 }
 0x26f   : > { %1732 = vtanh.f32 %v755_v33  ;;  %v758_v8 = vadd.f32 %v2261_v57, %v757_v2  ;;  %1496 = vmatmul.mubr.bf16.gmra.mrb[36].mxu0 %v812_v25  ;;  %v2298_v57 = vld [vmem:[%s2452_s2 + $0x2] ss:$0 sm:$0xff] }
 0x270   : > { %v1723_v12 = vpop.eup %1722  ;;  %1734 = vtanh.f32 %v766_v62 }
 0x271   : > { %v1725_v19 = vpop.eup %1724  ;;  %1736 = vtanh.f32 %v758_v8 }
 0x272   : > { %v1727_v35 = vpop.eup %1726 }
 0x273   : > { %v1729_v36 = vpop.eup %1728  ;;  %v814_v37 = vpack.c.bf16 %v1727_v35, %v1723_v12 }
 0x274   : > { %v813_v38 = vpack.c.bf16 %v1729_v36, %v1725_v19 }
 0x276   : > { %1499 = vmatprep.mubr.bf16.mxu0 %v813_v38 }
 0x277   : > { %1500 = vmatmul.mubr.bf16.gmra.mrb[40].mxu0 %v814_v37 }
 0x278   : > { %v1731_v39 = vpop.eup %1730 }
 0x279   : > { %v1733_v40 = vpop.eup %1732 }
 0x27a   : > { %v1735_v41 = vpop.eup %1734 }
 0x27b   : > { %v1737_v46 = vpop.eup %1736  ;;  %v816_v47 = vpack.c.bf16 %v1735_v41, %v1731_v39 }
 0x27c   : > { %v815_v48 = vpack.c.bf16 %v1737_v46, %v1733_v40 }
 0x27e   : > { %1503 = vmatprep.mubr.bf16.mxu0 %v815_v48 }
 0x27f   : > { %1504 = vmatmul.mubr.bf16.gmra.mrb[44].mxu0 %v816_v47 }
 0x318   : > { %v1477_v49 = vpop.f32.mrb[16].mxu0 }
 0x319   : > { %v933_v50 = vadd.f32 %v1477_v49, %v2298_v57  ;;  %v924_v51 = vpop.f32.mrb[17].mxu0 }
 0x31a   : > { %v925_v52 = vadd.f32 %v2298_v57, %v924_v51  ;;  %v1478_v53 = vpop.f32.mrb[18].mxu0 }
 0x31b   : > { %1738 = vtanh.f32 %v933_v50  ;;  %v936_v56 = vadd.f32 %v1478_v53, %v2298_v57  ;;  %v927_v58 = vpop.f32.mrb[19].mxu0 }
 0x31c   : > { %1740 = vtanh.f32 %v925_v52  ;;  %v928_v59 = vadd.f32 %v2298_v57, %v927_v58 }
 0x31d   : > { %1742 = vtanh.f32 %v936_v56 }
 0x31e   : > { %1744 = vtanh.f32 %v928_v59 }
 0x321   : > { %v1481_v60 = vpop.f32.mrb[20].mxu0 }
 0x322   : > { %v949_v61 = vadd.f32 %v1481_v60, %v2298_v57  ;;  %v940_v63 = vpop.f32.mrb[21].mxu0 }
 0x323   : > { %v941_v0 = vadd.f32 %v2298_v57, %v940_v63  ;;  %v1482_v1 = vpop.f32.mrb[22].mxu0 }
 0x324   : > { %1746 = vtanh.f32 %v949_v61  ;;  %v952_v3 = vadd.f32 %v1482_v1, %v2298_v57  ;;  %v943_v5 = vpop.f32.mrb[23].mxu0 }
 0x325   : > { %1748 = vtanh.f32 %v941_v0  ;;  %v944_v6 = vadd.f32 %v2298_v57, %v943_v5  ;;  %v1739_v7 = vpop.eup %1738 }
 0x326   : > { %1750 = vtanh.f32 %v952_v3  ;;  %v1741_v9 = vpop.eup %1740  ;;  %v1085_v10 = vadd.f32 %v1739_v7, %v2131_v14 }
 0x327   : > { %1752 = vtanh.f32 %v944_v6  ;;  %v1743_v11 = vpop.eup %1742  ;;  %v1083_v18 = vadd.f32 %v1802_v13, %v1741_v9 }
 0x328   : > { %v1745_v4 = vpop.eup %1744  ;;  %1117 = vst [vmem:[%s2312_s10 + $0x10] sm:$0xff] %v1085_v10  ;;  %v1086_v20 = vadd.f32 %v1743_v11, %v2134_v15 }
 0x329   : > { %1115 = vst [vmem:[%s2312_s10] sm:$0xff] %v1083_v18  ;;  %v1084_v23 = vadd.f32 %v1803_v22, %v1745_v4  ;;  %v1804_v18 = vld [vmem:[%s2116_s9 + $0x90] sm:$0xff] }
 0x32a   : > { %v1485_v21 = vpop.f32.mrb[24].mxu0  ;;  %1118 = vst [vmem:[%s2312_s10 + $0x18] sm:$0xff] %v1086_v20 }
 0x32b   : > { %v965_v14 = vadd.f32 %v1485_v21, %v2298_v57  ;;  %v956_v24 = vpop.f32.mrb[25].mxu0  ;;  %1116 = vst [vmem:[%s2312_s10 + $0x8] sm:$0xff] %v1084_v23  ;;  %v1805_v21 = vld [vmem:[%s2116_s9 + $0x80] sm:$0xff] }
 0x32c   : > { %v957_v25 = vadd.f32 %v2298_v57, %v956_v24  ;;  %v1486_v26 = vpop.f32.mrb[26].mxu0 }
 0x32d   : > { %1754 = vtanh.f32 %v965_v14  ;;  %v968_v27 = vadd.f32 %v1486_v26, %v2298_v57  ;;  %v959_v32 = vpop.f32.mrb[27].mxu0  ;;  %v1806_v14 = vld [vmem:[%s2116_s9 + $0x98] sm:$0xff]  ;;  %v1807_v26 = vld [vmem:[%s2116_s9 + $0x88] sm:$0xff] }
 0x32e   : > { %1756 = vtanh.f32 %v957_v25  ;;  %v960_v15 = vadd.f32 %v2298_v57, %v959_v32  ;;  %v1747_v33 = vpop.eup %1746 }
 0x32f   : > { %1758 = vtanh.f32 %v968_v27  ;;  %v1749_v34 = vpop.eup %1748  ;;  %v1089_v62 = vadd.f32 %v1747_v33, %v2151_v28 }
 0x330   : > { %1760 = vtanh.f32 %v960_v15  ;;  %v1751_v2 = vpop.eup %1750  ;;  %v1087_v8 = vadd.f32 %v1749_v34, %v2137_v16 }
 0x331   : > { %v1753_v12 = vpop.eup %1752  ;;  %1121 = vst [vmem:[%s2312_s10 + $0x30] sm:$0xff] %v1089_v62  ;;  %v1090_v19 = vadd.f32 %v1751_v2, %v2154_v29 }
 0x332   : > { %v1489_v35 = vpop.f32.mrb[28].mxu0  ;;  %1119 = vst [vmem:[%s2312_s10 + $0x20] sm:$0xff] %v1087_v8  ;;  %v1088_v36 = vadd.f32 %v1753_v12, %v2140_v17 }
 0x333   : > { %v981_v37 = vadd.f32 %v1489_v35, %v2298_v57  ;;  %v972_v38 = vpop.f32.mrb[29].mxu0  ;;  %1122 = vst [vmem:[%s2312_s10 + $0x38] sm:$0xff] %v1090_v19  ;;  %v1808_v35 = vld [vmem:[%s2116_s9 + $0xb0] sm:$0xff] }
 0x334   : > { %v973_v39 = vadd.f32 %v2298_v57, %v972_v38  ;;  %v1490_v28 = vpop.f32.mrb[30].mxu0  ;;  %1120 = vst [vmem:[%s2312_s10 + $0x28] sm:$0xff] %v1088_v36  ;;  %v1809_v38 = vld [vmem:[%s2116_s9 + $0xa0] sm:$0xff] }
 0x335   : > { %1762 = vtanh.f32 %v981_v37  ;;  %v984_v16 = vadd.f32 %v1490_v28, %v2298_v57  ;;  %v975_v40 = vpop.f32.mrb[31].mxu0 }
 0x336   : > { %1764 = vtanh.f32 %v973_v39  ;;  %v976_v29 = vadd.f32 %v2298_v57, %v975_v40 }
 0x337   : > { %v1755_v41 = vpop.eup %1754  ;;  %1766 = vtanh.f32 %v984_v16  ;;  %v1810_v16 = vld [vmem:[%s2116_s9 + $0xb8] sm:$0xff] }
 0x338   : > { %v1757_v17 = vpop.eup %1756  ;;  %v1093_v46 = vadd.f32 %v1755_v41, %v2171_v42  ;;  %1768 = vtanh.f32 %v976_v29  ;;  %v1811_v41 = vld [vmem:[%s2116_s9 + $0xa8] sm:$0xff] }
 0x339   : > { %v1759_v47 = vpop.eup %1758  ;;  %v1091_v48 = vadd.f32 %v1757_v17, %v2157_v30 }
 0x33a   : > { %v1761_v49 = vpop.eup %1760  ;;  %1125 = vst [vmem:[%s2312_s10 + $0x50] sm:$0xff] %v1093_v46  ;;  %v1094_v50 = vadd.f32 %v1759_v47, %v2174_v43  ;;  %v1493_v51 = vpop.f32.mrb[32].mxu0 }
 0x33b   : > { %1123 = vst [vmem:[%s2312_s10 + $0x40] sm:$0xff] %v1091_v48  ;;  %v1092_v52 = vadd.f32 %v1761_v49, %v2160_v31  ;;  %v997_v53 = vadd.f32 %v1493_v51, %v2298_v57  ;;  %v988_v56 = vpop.f32.mrb[33].mxu0 }
 0x33c   : > { %1126 = vst [vmem:[%s2312_s10 + $0x58] sm:$0xff] %v1094_v50  ;;  %v989_v58 = vadd.f32 %v2298_v57, %v988_v56  ;;  %v1494_v42 = vpop.f32.mrb[34].mxu0 }
 0x33d   : > { %1124 = vst [vmem:[%s2312_s10 + $0x48] sm:$0xff] %v1092_v52  ;;  %1770 = vtanh.f32 %v997_v53  ;;  %v1000_v30 = vadd.f32 %v1494_v42, %v2298_v57  ;;  %v991_v59 = vpop.f32.mrb[35].mxu0 }
 0x33e   : > { %1772 = vtanh.f32 %v989_v58  ;;  %v992_v43 = vadd.f32 %v2298_v57, %v991_v59  ;;  %v1812_v58 = vld [vmem:[%s2116_s9 + $0xd0] sm:$0xff]  ;;  %v1813_v59 = vld [vmem:[%s2116_s9 + $0xc0] sm:$0xff] }
 0x33f   : > { %v1763_v60 = vpop.eup %1762  ;;  %1774 = vtanh.f32 %v1000_v30 }
 0x340   : > { %v1765_v31 = vpop.eup %1764  ;;  %v1097_v61 = vadd.f32 %v1763_v60, %v2191_v54  ;;  %1776 = vtanh.f32 %v992_v43 }
 0x341   : > { %v1767_v63 = vpop.eup %1766  ;;  %v1095_v0 = vadd.f32 %v1765_v31, %v2177_v44  ;;  %v1814_v31 = vld [vmem:[%s2116_s9 + $0xd8] sm:$0xff] }
 0x342   : > { %v1769_v1 = vpop.eup %1768  ;;  %1129 = vst [vmem:[%s2312_s10 + $0x70] sm:$0xff] %v1097_v61  ;;  %v1098_v3 = vadd.f32 %v1767_v63, %v2194_v55  ;;  %v1497_v5 = vpop.f32.mrb[36].mxu0 }
 0x343   : > { %1127 = vst [vmem:[%s2312_s10 + $0x60] sm:$0xff] %v1095_v0  ;;  %v1096_v6 = vadd.f32 %v1769_v1, %v2180_v45  ;;  %v1013_v7 = vadd.f32 %v1497_v5, %v2298_v57  ;;  %v1004_v9 = vpop.f32.mrb[37].mxu0 }
 0x344   : > { %1130 = vst [vmem:[%s2312_s10 + $0x78] sm:$0xff] %v1098_v3  ;;  %v1005_v54 = vadd.f32 %v2298_v57, %v1004_v9  ;;  %v1498_v10 = vpop.f32.mrb[38].mxu0  ;;  %v1816_v3 = vld [vmem:[%s2116_s9 + $0xf0] sm:$0xff] }
 0x345   : > { %1128 = vst [vmem:[%s2312_s10 + $0x68] sm:$0xff] %v1096_v6  ;;  %1778 = vtanh.f32 %v1013_v7  ;;  %v1016_v44 = vadd.f32 %v1498_v10, %v2298_v57  ;;  %v1007_v55 = vpop.f32.mrb[39].mxu0  ;;  %v1817_v7 = vld [vmem:[%s2116_s9 + $0xe0] sm:$0xff]  ;;  %v1818_v10 = vld [vmem:[%s2116_s9 + $0xf8] sm:$0xff] }
 0x346   : > { %1780 = vtanh.f32 %v1005_v54  ;;  %v1008_v11 = vadd.f32 %v2298_v57, %v1007_v55  ;;  %v1819_v55 = vld [vmem:[%s2116_s9 + $0xe8] sm:$0xff] }
 0x347   : > { %v1771_v45 = vpop.eup %1770  ;;  %1782 = vtanh.f32 %v1016_v44 }
 0x348   : > { %v1773_v13 = vpop.eup %1772  ;;  %v1101_v4 = vadd.f32 %v1804_v18, %v1771_v45  ;;  %1784 = vtanh.f32 %v1008_v11 }
 0x349   : > { %v1775_v20 = vpop.eup %1774  ;;  %v1099_v22 = vadd.f32 %v1805_v21, %v1773_v13 }
 0x34a   : > { %v1777_v23 = vpop.eup %1776  ;;  %1133 = vst [vmem:[%s2312_s10 + $0x90] sm:$0xff] %v1101_v4  ;;  %v1102_v24 = vadd.f32 %v1806_v14, %v1775_v20  ;;  %v1501_v25 = vpop.f32.mrb[40].mxu0 }
 0x34b   : > { %1131 = vst [vmem:[%s2312_s10 + $0x80] sm:$0xff] %v1099_v22  ;;  %v1100_v27 = vadd.f32 %v1807_v26, %v1777_v23  ;;  %v1029_v32 = vadd.f32 %v1501_v25, %v2298_v57  ;;  %v1020_v15 = vpop.f32.mrb[41].mxu0 }
 0x34c   : > { %1134 = vst [vmem:[%s2312_s10 + $0x98] sm:$0xff] %v1102_v24  ;;  %v1021_v33 = vadd.f32 %v2298_v57, %v1020_v15  ;;  %v1502_v34 = vpop.f32.mrb[42].mxu0 }
 0x34d   : > { %1132 = vst [vmem:[%s2312_s10 + $0x88] sm:$0xff] %v1100_v27  ;;  %1786 = vtanh.f32 %v1029_v32  ;;  %v1032_v62 = vadd.f32 %v1502_v34, %v2298_v57  ;;  %v1023_v2 = vpop.f32.mrb[43].mxu0 }
 0x34e   : > { %1788 = vtanh.f32 %v1021_v33  ;;  %v1024_v8 = vadd.f32 %v2298_v57, %v1023_v2 }
 0x34f   : > { %v1779_v12 = vpop.eup %1778  ;;  %1790 = vtanh.f32 %v1032_v62 }
 0x350   : > { %v1781_v19 = vpop.eup %1780  ;;  %v1105_v36 = vadd.f32 %v1808_v35, %v1779_v12  ;;  %1792 = vtanh.f32 %v1024_v8 }
 0x351   : > { %v1783_v37 = vpop.eup %1782  ;;  %v1103_v39 = vadd.f32 %v1809_v38, %v1781_v19 }
 0x352   : > { %v1785_v28 = vpop.eup %1784  ;;  %1137 = vst [vmem:[%s2312_s10 + $0xb0] sm:$0xff] %v1105_v36  ;;  %v1106_v40 = vadd.f32 %v1810_v16, %v1783_v37  ;;  %v1505_v29 = vpop.f32.mrb[44].mxu0 }
 0x353   : > { %1135 = vst [vmem:[%s2312_s10 + $0xa0] sm:$0xff] %v1103_v39  ;;  %v1104_v17 = vadd.f32 %v1811_v41, %v1785_v28  ;;  %v1045_v46 = vadd.f32 %v1505_v29, %v2298_v57  ;;  %v1036_v47 = vpop.f32.mrb[45].mxu0 }
 0x354   : > { %1138 = vst [vmem:[%s2312_s10 + $0xb8] sm:$0xff] %v1106_v40  ;;  %v1037_v48 = vadd.f32 %v2298_v57, %v1036_v47  ;;  %v1506_v49 = vpop.f32.mrb[46].mxu0 }
 0x355   : > { %1136 = vst [vmem:[%s2312_s10 + $0xa8] sm:$0xff] %v1104_v17  ;;  %1794 = vtanh.f32 %v1045_v46  ;;  %v1048_v50 = vadd.f32 %v1506_v49, %v2298_v57  ;;  %v1039_v51 = vpop.f32.mrb[47].mxu0 }
 0x356   : > { %1796 = vtanh.f32 %v1037_v48  ;;  %v1040_v52 = vadd.f32 %v2298_v57, %v1039_v51  ;;  %v1815_v57 = vld [vmem:[%s2116_s9 + $0xc8] sm:$0xff] }
 0x357   : > { %v1787_v53 = vpop.eup %1786  ;;  %1798 = vtanh.f32 %v1048_v50 }
 0x358   : > { %v1789_v56 = vpop.eup %1788  ;;  %v1109_v42 = vadd.f32 %v1812_v58, %v1787_v53  ;;  %1800 = vtanh.f32 %v1040_v52 }
 0x359   : > { %v1791_v30 = vpop.eup %1790  ;;  %v1107_v43 = vadd.f32 %v1813_v59, %v1789_v56 }
 0x35a   : > { %v1793_v60 = vpop.eup %1792  ;;  %1141 = vst [vmem:[%s2312_s10 + $0xd0] sm:$0xff] %v1109_v42  ;;  %v1110_v61 = vadd.f32 %v1814_v31, %v1791_v30 }
 0x35b   : > { %1139 = vst [vmem:[%s2312_s10 + $0xc0] sm:$0xff] %v1107_v43  ;;  %v1108_v63 = vadd.f32 %v1815_v57, %v1793_v60 }
 0x35c   : > { %1142 = vst [vmem:[%s2312_s10 + $0xd8] sm:$0xff] %v1110_v61 }
 0x35d   : > { %1140 = vst [vmem:[%s2312_s10 + $0xc8] sm:$0xff] %v1108_v63 }
 0x35f   : > { %v1795_v0 = vpop.eup %1794 }
 0x360   : > { %v1797_v1 = vpop.eup %1796  ;;  %v1113_v5 = vadd.f32 %v1816_v3, %v1795_v0 }
 0x361   : > { %v1799_v6 = vpop.eup %1798  ;;  %v1111_v9 = vadd.f32 %v1817_v7, %v1797_v1 }
 0x362   : > { %v1801_v54 = vpop.eup %1800  ;;  %1145 = vst [vmem:[%s2312_s10 + $0xf0] sm:$0xff] %v1113_v5  ;;  %v1114_v44 = vadd.f32 %v1818_v10, %v1799_v6 }
 0x363   : > { %1143 = vst [vmem:[%s2312_s10 + $0xe0] sm:$0xff] %v1111_v9  ;;  %v1112_v11 = vadd.f32 %v1819_v55, %v1801_v54 }
 0x364   : > { %1146 = vst [vmem:[%s2312_s10 + $0xf8] sm:$0xff] %v1114_v44 }
 0x365   : > { %1144 = vst [vmem:[%s2312_s10 + $0xe8] sm:$0xff] %v1112_v11 }
 0x366   : > { %1891 = shalt.err (!%p1888_p7)
}
 0x367   : > { %s1892_s9 = scalar_lea.hbm %s2401_s23, 4096  ;;  %s1896_s4 = scalar_lea.hbm %s2453_s3, 16384 }
 0x368   : > { %p1893_p9 = scmp.ne.s32.totalorder %s2401_s23, %s1892_s9  ;;  %p1897_p5 = scmp.lt.u32.totalorder %s2401_s23, %s2453_s3 }
 0x369   : > { %p1898_p10 = scmp.lt.u32.totalorder %s1896_s4, %s1892_s9  ;;  %p1900_p1 = scmp.lt.u32.totalorder %s1892_s9, %s2401_s23 }
 0x36a   : > { %p1894_p11 = pnand %p1893_p9, %p2062_p12 }
 0x36b   : > { %p1899_p2 = por %p1898_p10, %p1897_p5 }
 0x36c   : > { %p1895_p0 = pneg %p1894_p11 }
 0x36d   : > { %p1901_p4 = por %p1900_p1, %p1899_p2 }
 0x36f   : > { %p1902_p6 = pnand %p1901_p4, %p1895_p0 }
 0x371   : > { %1905 = shalt.err (!%p1902_p6)
}
 0x372   : > { %s1957_s5 = smov 128   ;;  %s1958_s10 = smov 8  }
 0x373   : > { %1529 = dma.vmem_to_hbm [thread:$0]  (%p2062_p12), %s2403_s27, 4096, %s2401_s23, %s1148_s16, %s1957_s5, %s1957_s5, %s1958_s10  }
 0x374 PF: > { %p1546_p8 = scmp.ge.s32.totalorder %s1948_s15, 2  ;;  %s1176_s11 = sand.u32 1, %s1936_s12  }
 0x375   : > { %p2468_p13 = scmp.ne.s32.totalorder %s2458_s19, 0  ;;  %s1177_s28 = scalar_lea.sflag [#allocation4], %s1176_s11 }
 0x377   : > { %p1540_p3 = pnand %p1546_p8, %p2468_p13 }
 0x379   : > { %1931 = dma.done.wait (!%p1540_p3), %s1177_s28, 4096  }
 0x37a   : > { %1933 = vsyncadd (!%p1540_p3), %s1177_s28, 4294963200  ;;  %p17_p7 = scmp.ge.s32.totalorder %s2032_s24, 6   ;;  %s2469_s12 = smov %s1940_s13 }
 0x37b   : > { %s2470_s13 = smov %s1944_s14  ;;  %s2471_s14 = smov %s2058_s17 }
 0x37c   : > { %s2472_s15 = smov %s2032_s24  ;;  %19 = sbr.rel (!%p17_p7) target bundleno = 6 (0x6), region = 85 }
 0x383   :  { %1182 = vsyncpa [#allocation3], 1 }
 0x384   :  { %1184 = vsyncpa [#allocation3 + $0x1], 1 }
 0x385   :  { %1185 = vsyncpa [#allocation6], 1 }
 0x386   :  { %1186 = vsyncpa [#allocation4], 1 }
 0x387   :  { %1188 = vsyncpa [#allocation4 + $0x1], 1 }

// kernel: tpu_custom_call.1
= control target key start
LH: loop header
LB: loop body
LE: loop exit
PB: predicated region body
PF: predicated region fallthrough
CT: control target
= control target key end

     0   :  { %8 = vsyncpa [#allocation3], 0  ;;  %s2450_s0 = inlined_call_operand.hbm [shape: f32[1024,128], index: 0, kind: input, shape index: {}]   ;;  %s2451_s1 = inlined_call_operand.hbm [shape: bf16[3,128,128], index: 1, kind: input, shape index: {}]   ;;  %s2452_s2 = inlined_call_operand.vmem [shape: f32[3,1,128], index: 2, kind: input, shape index: {}]   ;;  %s2453_s3 = inlined_call_operand.hbm [shape: f32[1024,128], index: 3, kind: output, shape index: {}]  }
   0x1   :  { %10 = vsyncpa [#allocation3 + $0x1], 0 }
   0x2   :  { %11 = vsyncpa [#allocation6], 0 }
   0x3   :  { %12 = vsyncpa [#allocation4], 0 }
   0x4   :  { %14 = vsyncpa [#allocation4 + $0x1], 0  ;;  %s1979_s12 = smov 0   ;;  %s1981_s13 = smov 0  }
   0x5   :  { %s1983_s14 = smov 0   ;;  %s1985_s15 = smov 0  }
   0x6 LB: > { %s2000_s16 = sadd.s32 4294967295, %s1948_s15   ;;  %s1244_s17 = sadd.s32 4294967294, %s1948_s15   ;;  %s1948_s15 = sphi %s1985_s15, %s2472_s15   ;;  %s1944_s14 = sphi %s1983_s14, %s2471_s14   ;;  %s1940_s13 = sphi %s1981_s13, %s2470_s13   ;;  %s1936_s12 = sphi %s1979_s12, %s2469_s12  }
   0x7   : > { %p40_p0 = scmp.ne.s32.totalorder %s1940_s13, %s1936_s12  ;;  %p2454_p1 = scmp.eq.s32.totalorder %s2000_s16, 0 }
   0x8   : > { %p112_p3 = scmp.eq.s32.totalorder %s1244_s17, 3  ;;  %p1245_p5 = scmp.ge.s32.totalorder %s1948_s15, 1 }
   0x9   : > { %p2009_p4 = por %p2454_p1, %p40_p0  ;;  %p119_p7 = scmp.lt.s32.totalorder %s1948_s15, 5 }
   0xa   : > { %p2014_p6 = por %p112_p3, %p40_p0  ;;  %s1950_s21 = smov [#allocation5]  }
   0xb   : > { %s2457_s18 = scalar_select %p2009_p4, 1, 0 }
   0xc   : > { %s2458_s19 = scalar_select %p2014_p6, 1, 0 }
   0xd   : > { %p2019_p8 = pnand %p1245_p5, %p119_p7  ;;  %s131_s22 = sshll.u32 %s1950_s21, 4  ;;  %s132_s22 = int_to_ptr.vmem [resolvable:$true] %s131_s22 }
   0xe   : > { %s2032_s24 = sadd.s32 1, %s1948_s15   ;;  %s27_s25 = sadd.s32 1, %s1944_s14 }
   0xf   : > { %s2459_s20 = scalar_select %p2019_p8, 1, 0 }
  0x10   : > { %p1531_p9 = pneg %p2019_p8  ;;  %s24_s26 = ssub.s32 %s1948_s15, %s2032_s24 }
  0x11   : > { %s1820_s29 = scalar_lea.hbm %s2451_s1, 3072 }
  0x12   : > { %p2027_p10 = pnand %p1531_p9, %p2454_p1  ;;  %p1821_p11 = scmp.ne.s32.totalorder %s2451_s1, %s1820_s29 }
  0x13   : > { %p1827_p3 = scmp.lt.u32.totalorder %s1820_s29, %s2451_s1 }
  0x14   : > { %p1822_p12 = pneg %p2027_p10 }
  0x16   : > { %p1823_p13 = pnand %p1822_p12, %p1821_p11 }
  0x18   : > { %p1824_p0 = pneg %p1823_p13 }
  0x1a   : > { %p1829_p5 = pnand %p1827_p3, %p1824_p0 }
  0x1c   : > { %1832 = shalt.err (!%p1829_p5)
}
  0x1d   : > { %s1833_s7 = scalar_lea.vmem %s132_s22, 3072  ;;  %p1841_p2 = scmp.lt.s32.totalorder %s132_s22, %s132_s22 }
  0x1e   : > { %p1834_p7 = scmp.ne.s32.totalorder %s132_s22, %s1833_s7  ;;  %p1842_p6 = scmp.lt.s32.totalorder %s1833_s7, %s1833_s7 }
  0x20   : > { %p1836_p9 = pnand %p1834_p7, %p1822_p12  ;;  %p1843_p4 = por %p1842_p6, %p1841_p2 }
  0x22   : > { %p1837_p1 = pneg %p1836_p9 }
  0x24   : > { %p1844_p8 = pnand %p1843_p4, %p1837_p1 }
  0x26   : > { %1847 = shalt.err (!%p1844_p8)
}
  0x27   : > { %s1951_s8 = smov 64   ;;  %s1952_s9 = smov 4  }
  0x28   : > { %1534 = dma.hbm_to_vmem [thread:$0]  (!%p2027_p10), %s2451_s1, 3072, %s132_s22, [#allocation6], %s1951_s8, %s1951_s8, %s1952_s9  }
  0x29   : > { %p25_p11 = scmp.eq.s32.totalorder %s24_s26, 0  ;;  %p34_p2 = scmp.ne.s32.totalorder %s1944_s14, %s1940_s13 }
  0x2a   : > { %p35_p1 = scmp.eq.s32.totalorder %s1948_s15, 0  ;;  %p1544_p4 = scmp.lt.s32.totalorder %s1948_s15, 4 }
  0x2b   : > { %s2058_s17 = scalar_select %p25_p11, %s1944_s14, %s27_s25  }
  0x2c   : > { %p36_p6 = por %p35_p1, %p34_p2  ;;  %p2461_p8 = scmp.eq.s32.totalorder %s2000_s16, 3 }
  0x2d   : > { %s148_s27 = sand.u32 1, %s1944_s14   ;;  %s1289_s28 = sshll.u32 %s1948_s15, 12 }
  0x2e   : > { %p2062_p12 = por %p2461_p8, %p34_p2  ;;  %s1248_s29 = sshll.u32 %s148_s27, 8 }
  0x2f   : > { %s2071_s4 = scalar_lea.hbm %s2450_s0, %s1289_s28  ;;  %s152_s22 = scalar_lea.vmem [#allocation2], %s1248_s29 }
  0x30   : > { %s159_s25 = sshll.u32 %s152_s22, 4  ;;  %p2073_p10 = pnand %p1544_p4, %p36_p6  ;;  %s2077_s25 = int_to_ptr.vmem [resolvable:$true] %s159_s25 }
  0x31   : > { %s2079_s5 = scalar_lea.sflag [#allocation3], %s148_s27  ;;  %s1848_s6 = scalar_lea.hbm %s2071_s4, 4096 }
  0x32   : > { %p1849_p13 = scmp.ne.s32.totalorder %s2071_s4, %s1848_s6  ;;  %p1850_p0 = pneg %p2073_p10 }
  0x33   : > { %s1853_s9 = scalar_lea.hbm %s2450_s0, 16384  ;;  %p1854_p7 = scmp.lt.u32.totalorder %s2071_s4, %s2450_s0 }
  0x34   : > { %p1851_p3 = pnand %p1850_p0, %p1849_p13  ;;  %p1855_p9 = scmp.lt.u32.totalorder %s1853_s9, %s1848_s6 }
  0x35   : > { %p1857_p2 = scmp.lt.u32.totalorder %s1848_s6, %s2071_s4 }
  0x36   : > { %p1852_p5 = pneg %p1851_p3  ;;  %p1856_p11 = por %p1855_p9, %p1854_p7 }
  0x38   : > { %p1858_p1 = por %p1857_p2, %p1856_p11 }
  0x3a   : > { %p1859_p4 = pnand %p1858_p1, %p1852_p5 }
  0x3c   : > { %1862 = shalt.err (!%p1859_p4)
}
  0x3d   : > { %s1863_s27 = scalar_lea.vmem %s2077_s25, 4096  ;;  %s1953_s28 = smov [#allocation2]  }
  0x3e   : > { %p1864_p6 = scmp.ne.s32.totalorder %s2077_s25, %s1863_s27  ;;  %s1868_s29 = sshll.u32 %s1953_s28, 4  ;;  %s1869_s29 = int_to_ptr.vmem [resolvable:$false] %s1868_s29 }
  0x3f   : > { %s1870_s23 = scalar_lea.vmem %s1869_s29, 8192  ;;  %p1871_p3 = scmp.lt.s32.totalorder %s2077_s25, %s1869_s29 }
  0x40   : > { %p1866_p8 = pnand %p1864_p6, %p1850_p0  ;;  %p1872_p7 = scmp.lt.s32.totalorder %s1870_s23, %s1863_s27 }
  0x42   : > { %p1867_p13 = pneg %p1866_p8  ;;  %p1873_p9 = por %p1872_p7, %p1871_p3 }
  0x44   : > { %p1874_p11 = pnand %p1873_p9, %p1867_p13 }
  0x46   : > { %1877 = shalt.err (!%p1874_p11)
}
  0x47   : > { %s1954_s30 = smov 128   ;;  %s1955_s22 = smov 8  }
  0x48   : > { %1538 = dma.hbm_to_vmem [thread:$0]  (!%p2073_p10), %s2071_s4, 4096, %s2077_s25, %s2079_s5, %s1954_s30, %s1954_s30, %s1955_s22  }
  0x49   : > { %p2464_p0 = scmp.ne.s32.totalorder %s2459_s20, 0 }
  0x4a   : > { %s2110_s6 = sand.u32 (!%p2464_p0), 1, %s1940_s13   ;;  %p2465_p5 = scmp.ne.s32.totalorder (!%p2464_p0), %s2457_s18, 0 }
  0x4b   : > { %171 = sbr.rel (%p2464_p0) target bundleno = 884 (0x374), region = 32  ;;  %s1252_s7 = sshll.u32 (!%p2464_p0), %s2110_s6, 8 }
  0x4c   : > { %s174_s8 = scalar_lea.sflag (!%p2464_p0), [#allocation3], %s2110_s6  ;;  %s2116_s9 = scalar_lea.vmem (!%p2464_p0), [#allocation2], %s1252_s7 }
  0x52   : > { %1923 = dma.done.wait (%p2465_p5), %s174_s8, 4096  }
  0x53   : > { %1925 = vsyncadd (%p2465_p5), %s174_s8, 4294963200  ;;  %p2466_p10 = scmp.eq.s32.totalorder %s2000_s16, 0 }
  0x55   : > { %1927 = dma.done.wait (%p2466_p10), [#allocation6], 3072   ;;  %p2467_p2 = pmov %p2466_p10 }
  0x56   : > { %v1586_v0 = vld [vmem:[#allocation5] sm:$0xff]   ;;  %v1587_v1 = vld [vmem:[#allocation5 + $0x8] sm:$0xff]   ;;  %v1588_v2 = vld [vmem:[#allocation5 + $0x10] sm:$0xff]   ;;  %s2312_s10 = scalar_lea.vmem [#allocation7], %s1252_s7  ;;  %s1290_s11 = sshll.u32 %s2000_s16, 12 }
  0x57   : > { %1929 = vsyncadd (%p2467_p2), [#allocation6], 4294964224  ;;  %1363 = vmatprep.subr.bf16.mxu0 %v1586_v0  ;;  %1507 = vmatprep.subr.bf16.mxu1 %v1586_v0  ;;  %v1589_v3 = vld [vmem:[#allocation5 + $0x18] sm:$0xff]   ;;  %v207_v4 = vld [vmem:[%s2116_s9] sm:$0xff]  ;;  %s1161_s27 = sshll.u32 %s2312_s10, 4  ;;  %s2401_s23 = scalar_lea.hbm %s2453_s3, %s1290_s11  ;;  %s2403_s27 = int_to_ptr.vmem [resolvable:$true] %s1161_s27 }
  0x58   : > { %1364 = vmatpush3.bf16.msra.mxu0 %v1586_v0  ;;  %1515 = vmatpush3.bf16.msra.mxu1 %v1586_v0  ;;  %v208_v5 = vld [vmem:[%s2116_s9 + $0x8] sm:$0xff]  ;;  %v1590_v7 = vld [vmem:[#allocation5 + $0x20] sm:$0xff]   ;;  %v1592_v12 = vld [vmem:[#allocation5 + $0x30] sm:$0xff]   ;;  %s1148_s16 = scalar_lea.sflag [#allocation4], %s2110_s6  ;;  %s1878_s30 = scalar_lea.vmem %s2403_s27, 4096 }
  0x59   : > { %1365 = vmatprep.subr.bf16.mxu0 %v1587_v1  ;;  %1508 = vmatprep.subr.bf16.mxu1 %v1587_v1  ;;  %v239_v6 = vpack.c.bf16 %v208_v5, %v207_v4  ;;  %v223_v8 = vld [vmem:[%s2116_s9 + $0x80] sm:$0xff]  ;;  %v224_v9 = vld [vmem:[%s2116_s9 + $0x88] sm:$0xff]  ;;  %v1593_v13 = vld [vmem:[#allocation5 + $0x38] sm:$0xff]   ;;  %p1879_p1 = scmp.ne.s32.totalorder %s2403_s27, %s1878_s30  ;;  %s1956_s22 = smov [#allocation7]  }
  0x5a   : > { %v247_v10 = vpack.c.bf16 %v224_v9, %v223_v8  ;;  %v1591_v11 = vld [vmem:[#allocation5 + $0x28] sm:$0xff]   ;;  %v2131_v14 = vld [vmem:[%s2116_s9 + $0x10] sm:$0xff]  ;;  %v2134_v15 = vld [vmem:[%s2116_s9 + $0x18] sm:$0xff]  ;;  %s1882_s7 = sshll.u32 %s1956_s22, 4  ;;  %s1883_s7 = int_to_ptr.vmem [resolvable:$false] %s1882_s7 }
  0x5b   : > { %1379 = vmatprep.mubr.bf16.mxu0 %v239_v6  ;;  %v2137_v16 = vld [vmem:[%s2116_s9 + $0x20] sm:$0xff]  ;;  %v2140_v17 = vld [vmem:[%s2116_s9 + $0x28] sm:$0xff]  ;;  %v225_v18 = vld [vmem:[%s2116_s9 + $0x90] sm:$0xff]  ;;  %v240_v23 = vpack.c.bf16 %v2134_v15, %v2131_v14  ;;  %p1880_p4 = pnand %p1879_p1, %p2062_p12  ;;  %s1884_s8 = scalar_lea.vmem %s1883_s7, 8192 }
  0x5c   : > { %1366 = vmatpush3.bf16.msra.mxu0 %v1587_v1  ;;  %1516 = vmatpush3.bf16.msra.mxu1 %v1587_v1  ;;  %v226_v19 = vld [vmem:[%s2116_s9 + $0x98] sm:$0xff]  ;;  %v227_v20 = vld [vmem:[%s2116_s9 + $0xa0] sm:$0xff]  ;;  %v228_v21 = vld [vmem:[%s2116_s9 + $0xa8] sm:$0xff]  ;;  %v241_v24 = vpack.c.bf16 %v2140_v17, %v2137_v16  ;;  %p1885_p8 = scmp.lt.s32.totalorder %s2403_s27, %s1883_s7  ;;  %p1886_p13 = scmp.lt.s32.totalorder %s1884_s8, %s1878_s30 }
  0x5d   : > { %1367 = vmatprep.subr.bf16.mxu0 %v1588_v2  ;;  %1509 = vmatprep.subr.bf16.mxu1 %v1588_v2  ;;  %v1594_v22 = vld [vmem:[#allocation5 + $0x40] sm:$0xff]   ;;  %v248_v25 = vpack.c.bf16 %v226_v19, %v225_v18  ;;  %v249_v26 = vpack.c.bf16 %v228_v21, %v227_v20  ;;  %v1595_v27 = vld [vmem:[#allocation5 + $0x48] sm:$0xff]   ;;  %v2151_v28 = vld [vmem:[%s2116_s9 + $0x30] sm:$0xff]  ;;  %p1881_p6 = pneg %p1880_p4 }
  0x5e   : > { %1395 = vmatprep.mubr.bf16.mxu1 %v247_v10  ;;  %v2154_v29 = vld [vmem:[%s2116_s9 + $0x38] sm:$0xff]  ;;  %v2157_v30 = vld [vmem:[%s2116_s9 + $0x40] sm:$0xff]  ;;  %v2160_v31 = vld [vmem:[%s2116_s9 + $0x48] sm:$0xff]  ;;  %p1887_p3 = por %p1886_p13, %p1885_p8 }
  0x5f   : > { %v229_v32 = vld [vmem:[%s2116_s9 + $0xb0] sm:$0xff]  ;;  %v230_v33 = vld [vmem:[%s2116_s9 + $0xb8] sm:$0xff]  ;;  %v231_v34 = vld [vmem:[%s2116_s9 + $0xc0] sm:$0xff]  ;;  %v242_v37 = vpack.c.bf16 %v2154_v29, %v2151_v28  ;;  %v243_v38 = vpack.c.bf16 %v2160_v31, %v2157_v30 }
  0x60   : > { %1368 = vmatpush3.bf16.msra.mxu0 %v1588_v2  ;;  %1517 = vmatpush3.bf16.msra.mxu1 %v1588_v2  ;;  %v232_v35 = vld [vmem:[%s2116_s9 + $0xc8] sm:$0xff]  ;;  %v1596_v36 = vld [vmem:[#allocation5 + $0x50] sm:$0xff]   ;;  %v250_v39 = vpack.c.bf16 %v230_v33, %v229_v32  ;;  %v1597_v41 = vld [vmem:[#allocation5 + $0x58] sm:$0xff]   ;;  %p1888_p7 = pnand %p1887_p3, %p1881_p6 }
  0x61   : > { %1369 = vmatprep.subr.bf16.mxu0 %v1589_v3  ;;  %1510 = vmatprep.subr.bf16.mxu1 %v1589_v3  ;;  %v251_v40 = vpack.c.bf16 %v232_v35, %v231_v34  ;;  %v2171_v42 = vld [vmem:[%s2116_s9 + $0x50] sm:$0xff]  ;;  %v2174_v43 = vld [vmem:[%s2116_s9 + $0x58] sm:$0xff]  ;;  %v2177_v44 = vld [vmem:[%s2116_s9 + $0x60] sm:$0xff] }
  0x62   : > { %v2180_v45 = vld [vmem:[%s2116_s9 + $0x68] sm:$0xff]  ;;  %v233_v46 = vld [vmem:[%s2116_s9 + $0xd0] sm:$0xff]  ;;  %v234_v47 = vld [vmem:[%s2116_s9 + $0xd8] sm:$0xff]  ;;  %v244_v50 = vpack.c.bf16 %v2174_v43, %v2171_v42 }
  0x63   : > { %v235_v48 = vld [vmem:[%s2116_s9 + $0xe0] sm:$0xff]  ;;  %v236_v49 = vld [vmem:[%s2116_s9 + $0xe8] sm:$0xff]  ;;  %v245_v51 = vpack.c.bf16 %v2180_v45, %v2177_v44  ;;  %v252_v52 = vpack.c.bf16 %v234_v47, %v233_v46  ;;  %v2191_v54 = vld [vmem:[%s2116_s9 + $0x70] sm:$0xff] }
  0x64   : > { %1370 = vmatpush3.bf16.msra.mxu0 %v1589_v3  ;;  %1518 = vmatpush3.bf16.msra.mxu1 %v1589_v3  ;;  %v253_v53 = vpack.c.bf16 %v236_v49, %v235_v48  ;;  %v2194_v55 = vld [vmem:[%s2116_s9 + $0x78] sm:$0xff]  ;;  %v237_v56 = vld [vmem:[%s2116_s9 + $0xf0] sm:$0xff]  ;;  %v1598_v60 = vld [vmem:[#allocation5 + $0x60] sm:$0xff]  }
  0x65   : > { %1371 = vmatprep.subr.bf16.mxu0 %v1590_v7  ;;  %1511 = vmatprep.subr.bf16.mxu1 %v1590_v7  ;;  %v238_v57 = vld [vmem:[%s2116_s9 + $0xf8] sm:$0xff]  ;;  %v246_v58 = vpack.c.bf16 %v2194_v55, %v2191_v54  ;;  %v1599_v61 = vld [vmem:[#allocation5 + $0x68] sm:$0xff]   ;;  %v1600_v62 = vld [vmem:[#allocation5 + $0x70] sm:$0xff]  }
  0x66   : > { %v254_v59 = vpack.c.bf16 %v238_v57, %v237_v56  ;;  %v1601_v63 = vld [vmem:[#allocation5 + $0x78] sm:$0xff]   ;;  %v1602_v0 = vld [vmem:[#allocation5 + $0x80] sm:$0xff]   ;;  %v1603_v1 = vld [vmem:[#allocation5 + $0x88] sm:$0xff]  }
  0x67   : > { %v1604_v2 = vld [vmem:[#allocation5 + $0x90] sm:$0xff]   ;;  %v1605_v3 = vld [vmem:[#allocation5 + $0x98] sm:$0xff]   ;;  %v2203_v4 = vld [vmem:[%s2452_s2] ss:$0 sm:$0xff] }
  0x68   : > { %1372 = vmatpush3.bf16.msra.mxu0 %v1590_v7  ;;  %1519 = vmatpush3.bf16.msra.mxu1 %v1590_v7 }
  0x69   : > { %1373 = vmatprep.subr.bf16.mxu0 %v1591_v11  ;;  %1512 = vmatprep.subr.bf16.mxu1 %v1591_v11 }
  0x6c   : > { %1374 = vmatpush3.bf16.msra.mxu0 %v1591_v11  ;;  %1520 = vmatpush3.bf16.msra.mxu1 %v1591_v11 }
  0x6d   : > { %1375 = vmatprep.subr.bf16.mxu0 %v1592_v12  ;;  %1513 = vmatprep.subr.bf16.mxu1 %v1592_v12 }
  0x70   : > { %1376 = vmatpush3.bf16.msra.mxu0 %v1592_v12  ;;  %1521 = vmatpush3.bf16.msra.mxu1 %v1592_v12 }
  0x71   : > { %1377 = vmatprep.subr.bf16.mxu0 %v1593_v13  ;;  %1514 = vmatprep.subr.bf16.mxu1 %v1593_v13 }
  0x74   : > { %1378 = vmatpush3.bf16.msra.mxu0 %v1593_v13  ;;  %1522 = vmatpush3.bf16.msra.mxu1 %v1593_v13 }
  0x75   : > { %1411 = vmatprep.subr.bf16.mxu1 %v1594_v22  ;;  %1459 = vmatprep.subr.bf16.mxu0 %v1602_v0 }
  0x77   : > { %1380 = vmatmul.mubr.bf16.vlgmr.msra.gmra.mrb[0].mxu0 %v240_v23  ;;  %1396 = vmatmul.mubr.bf16.vlgmr.msra.gmra.mrb[0].mxu1 %v248_v25 }
  0x78   : > { %1383 = vmatprep.mubr.bf16.mxu0 %v241_v24  ;;  %1399 = vmatprep.mubr.bf16.mxu1 %v249_v26 }
  0x79   : > { %1412 = vmatpush3.bf16.msra.mxu1 %v1594_v22  ;;  %1460 = vmatpush3.bf16.msra.mxu0 %v1602_v0 }
  0x7a   : > { %1413 = vmatprep.subr.bf16.mxu1 %v1595_v27  ;;  %1461 = vmatprep.subr.bf16.mxu0 %v1603_v1 }
  0x7d   : > { %1414 = vmatpush3.bf16.msra.mxu1 %v1595_v27  ;;  %1462 = vmatpush3.bf16.msra.mxu0 %v1603_v1 }
  0x7e   : > { %1415 = vmatprep.subr.bf16.mxu1 %v1596_v36  ;;  %1463 = vmatprep.subr.bf16.mxu0 %v1604_v2 }
  0x7f   : > { %1384 = vmatmul.mubr.bf16.gmra.mrb[4].mxu0 %v242_v37  ;;  %1400 = vmatmul.mubr.bf16.gmra.mrb[4].mxu1 %v250_v39 }
  0x80   : > { %1387 = vmatprep.mubr.bf16.mxu0 %v243_v38  ;;  %1403 = vmatprep.mubr.bf16.mxu1 %v251_v40 }
  0x81   : > { %1416 = vmatpush3.bf16.msra.mxu1 %v1596_v36  ;;  %1464 = vmatpush3.bf16.msra.mxu0 %v1604_v2 }
  0x82   : > { %1417 = vmatprep.subr.bf16.mxu1 %v1597_v41  ;;  %1465 = vmatprep.subr.bf16.mxu0 %v1605_v3 }
  0x85   : > { %1418 = vmatpush3.bf16.msra.mxu1 %v1597_v41  ;;  %1466 = vmatpush3.bf16.msra.mxu0 %v1605_v3 }
  0x86   : > { %1419 = vmatprep.subr.bf16.mxu1 %v1598_v60 }
  0x87   : > { %1388 = vmatmul.mubr.bf16.gmra.mrb[8].mxu0 %v244_v50  ;;  %1404 = vmatmul.mubr.bf16.gmra.mrb[8].mxu1 %v252_v52 }
  0x88   : > { %1391 = vmatprep.mubr.bf16.mxu0 %v245_v51  ;;  %1407 = vmatprep.mubr.bf16.mxu1 %v253_v53 }
  0x89   : > { %1420 = vmatpush3.bf16.msra.mxu1 %v1598_v60 }
  0x8a   : > { %1421 = vmatprep.subr.bf16.mxu1 %v1599_v61 }
  0x8d   : > { %1422 = vmatpush3.bf16.msra.mxu1 %v1599_v61 }
  0x8e   : > { %1423 = vmatprep.subr.bf16.mxu1 %v1600_v62 }
  0x8f   : > { %1392 = vmatmul.mubr.bf16.gmra.mrb[12].mxu0 %v246_v58  ;;  %1408 = vmatmul.mubr.bf16.gmra.mrb[12].mxu1 %v254_v59 }
  0x91   : > { %1424 = vmatpush3.bf16.msra.mxu1 %v1600_v62 }
  0x92   : > { %1425 = vmatprep.subr.bf16.mxu1 %v1601_v63 }
  0x95   : > { %1426 = vmatpush3.bf16.msra.mxu1 %v1601_v63 }
 0x14a   : > { %v1381_v5 = vpop.f32.mrb[0].mxu0  ;;  %v1397_v8 = vpop.f32.mrb[0].mxu1 }
 0x14b   : > { %v369_v6 = vadd.f32 %v1381_v5, %v2203_v4  ;;  %v360_v7 = vpop.f32.mrb[1].mxu0  ;;  %v424_v11 = vpop.f32.mrb[1].mxu1  ;;  %v433_v18 = vadd.f32 %v1397_v8, %v2203_v4 }
 0x14c   : > { %v361_v9 = vadd.f32 %v2203_v4, %v360_v7  ;;  %v1382_v10 = vpop.f32.mrb[2].mxu0  ;;  %v1398_v19 = vpop.f32.mrb[2].mxu1  ;;  %v425_v21 = vadd.f32 %v2203_v4, %v424_v11 }
 0x14d   : > { %1610 = vtanh.f32 %v369_v6  ;;  %v372_v12 = vadd.f32 %v1382_v10, %v2203_v4  ;;  %v363_v13 = vpop.f32.mrb[3].mxu0  ;;  %v427_v22 = vpop.f32.mrb[3].mxu1  ;;  %v436_v23 = vadd.f32 %v1398_v19, %v2203_v4 }
 0x14e   : > { %1612 = vtanh.f32 %v361_v9  ;;  %v364_v20 = vadd.f32 %v2203_v4, %v363_v13  ;;  %v428_v24 = vadd.f32 %v2203_v4, %v427_v22 }
 0x14f   : > { %1614 = vtanh.f32 %v372_v12 }
 0x150   : > { %1616 = vtanh.f32 %v364_v20 }
 0x151   : > { %1618 = vtanh.f32 %v433_v18 }
 0x152   : > { %v1385_v25 = vpop.f32.mrb[4].mxu0  ;;  %1620 = vtanh.f32 %v425_v21  ;;  %v1401_v32 = vpop.f32.mrb[4].mxu1 }
 0x153   : > { %v385_v26 = vadd.f32 %v1385_v25, %v2203_v4  ;;  %v376_v27 = vpop.f32.mrb[5].mxu0  ;;  %1622 = vtanh.f32 %v436_v23  ;;  %v440_v35 = vpop.f32.mrb[5].mxu1  ;;  %v449_v38 = vadd.f32 %v1401_v32, %v2203_v4 }
 0x154   : > { %v377_v33 = vadd.f32 %v2203_v4, %v376_v27  ;;  %v1386_v34 = vpop.f32.mrb[6].mxu0  ;;  %1624 = vtanh.f32 %v428_v24  ;;  %v1402_v39 = vpop.f32.mrb[6].mxu1  ;;  %v441_v41 = vadd.f32 %v2203_v4, %v440_v35 }
 0x155   : > { %1626 = vtanh.f32 %v385_v26  ;;  %v388_v36 = vadd.f32 %v1386_v34, %v2203_v4  ;;  %v379_v37 = vpop.f32.mrb[7].mxu0  ;;  %v443_v46 = vpop.f32.mrb[7].mxu1  ;;  %v452_v48 = vadd.f32 %v1402_v39, %v2203_v4 }
 0x156   : > { %1628 = vtanh.f32 %v377_v33  ;;  %v380_v40 = vadd.f32 %v2203_v4, %v379_v37  ;;  %v444_v50 = vadd.f32 %v2203_v4, %v443_v46 }
 0x157   : > { %v1611_v47 = vpop.eup %1610  ;;  %1630 = vtanh.f32 %v388_v36 }
 0x158   : > { %v1613_v49 = vpop.eup %1612  ;;  %1632 = vtanh.f32 %v380_v40 }
 0x159   : > { %v1615_v51 = vpop.eup %1614  ;;  %1634 = vtanh.f32 %v449_v38 }
 0x15a   : > { %v1617_v52 = vpop.eup %1616  ;;  %v1389_v53 = vpop.f32.mrb[8].mxu0  ;;  %v520_v56 = vpack.c.bf16 %v1615_v51, %v1611_v47  ;;  %1636 = vtanh.f32 %v441_v41 }
 0x15b   : > { %v2221_v57 = vpop.eup %1618  ;;  %v401_v58 = vadd.f32 %v1389_v53, %v2203_v4  ;;  %v392_v59 = vpop.f32.mrb[9].mxu0  ;;  %v519_v60 = vpack.c.bf16 %v1617_v52, %v1613_v49  ;;  %1638 = vtanh.f32 %v452_v48 }
 0x15c   : > { %v1405_v61 = vpop.f32.mrb[8].mxu1  ;;  %v2224_v62 = vpop.eup %1620  ;;  %v393_v63 = vadd.f32 %v2203_v4, %v392_v59  ;;  %1640 = vtanh.f32 %v444_v50 }
 0x15d   : > { %v1390_v0 = vpop.f32.mrb[10].mxu0  ;;  %v456_v1 = vpop.f32.mrb[9].mxu1  ;;  %1642 = vtanh.f32 %v401_v58  ;;  %1427 = vmatprep.mubr.bf16.mxu1 %v519_v60  ;;  %v465_v6 = vadd.f32 %v1405_v61, %v2203_v4 }
 0x15e   : > { %v2227_v2 = vpop.eup %1622  ;;  %v404_v3 = vadd.f32 %v1390_v0, %v2203_v4  ;;  %v395_v5 = vpop.f32.mrb[11].mxu0  ;;  %1644 = vtanh.f32 %v393_v63  ;;  %1428 = vmatmul.mubr.bf16.vlgmr.msra.gmra.mrb[16].mxu1 %v520_v56  ;;  %v457_v10 = vadd.f32 %v2203_v4, %v456_v1 }
 0x15f   : > { %v1406_v7 = vpop.f32.mrb[10].mxu1  ;;  %v2231_v8 = vpop.eup %1624  ;;  %v396_v9 = vadd.f32 %v2203_v4, %v395_v5  ;;  %v528_v12 = vpack.c.bf16 %v2227_v2, %v2221_v57  ;;  %v2261_v57 = vld [vmem:[%s2452_s2 + $0x1] ss:$0 sm:$0xff] }
 0x160   : > { %v459_v11 = vpop.f32.mrb[11].mxu1  ;;  %v1627_v13 = vpop.eup %1626  ;;  %1646 = vtanh.f32 %v404_v3  ;;  %v468_v18 = vadd.f32 %v1406_v7, %v2203_v4  ;;  %v527_v19 = vpack.c.bf16 %v2231_v8, %v2224_v62  ;;  %v1609_v62 = vld [vmem:[#allocation5 + $0xb8] sm:$0xff]  }
 0x161   : > { %v1629_v20 = vpop.eup %1628  ;;  %1648 = vtanh.f32 %v396_v9  ;;  %v460_v21 = vadd.f32 %v2203_v4, %v459_v11 }
 0x162   : > { %v1631_v22 = vpop.eup %1630  ;;  %1650 = vtanh.f32 %v465_v6  ;;  %v1393_v24 = vpop.f32.mrb[12].mxu0 }
 0x163   : > { %v1633_v23 = vpop.eup %1632  ;;  %v522_v25 = vpack.c.bf16 %v1631_v22, %v1627_v13  ;;  %1652 = vtanh.f32 %v457_v10  ;;  %v417_v27 = vadd.f32 %v1393_v24, %v2203_v4  ;;  %v408_v32 = vpop.f32.mrb[13].mxu0 }
 0x164   : > { %v2241_v26 = vpop.eup %1634  ;;  %v521_v33 = vpack.c.bf16 %v1633_v23, %v1629_v20  ;;  %1654 = vtanh.f32 %v468_v18  ;;  %v1409_v34 = vpop.f32.mrb[12].mxu1  ;;  %v409_v36 = vadd.f32 %v2203_v4, %v408_v32  ;;  %v1606_v32 = vld [vmem:[#allocation5 + $0xa0] sm:$0xff]  }
 0x165   : > { %v1637_v35 = vpop.eup %1636  ;;  %v1394_v37 = vpop.f32.mrb[14].mxu0  ;;  %1656 = vtanh.f32 %v460_v21  ;;  %v481_v46 = vadd.f32 %v1409_v34, %v2203_v4  ;;  %1467 = vmatprep.subr.bf16.mxu0 %v1606_v32  ;;  %v1608_v34 = vld [vmem:[#allocation5 + $0xb0] sm:$0xff]  }
 0x166   : > { %v472_v38 = vpop.f32.mrb[13].mxu1  ;;  %v1639_v39 = vpop.eup %1638  ;;  %1658 = vtanh.f32 %v417_v27  ;;  %v420_v40 = vadd.f32 %v1394_v37, %v2203_v4  ;;  %1431 = vmatprep.mubr.bf16.mxu1 %v521_v33  ;;  %1468 = vmatpush3.bf16.msra.mxu0 %v1606_v32  ;;  %v1607_v33 = vld [vmem:[#allocation5 + $0xa8] sm:$0xff]  }
 0x167   : > { %v411_v41 = vpop.f32.mrb[15].mxu0  ;;  %v1410_v47 = vpop.f32.mrb[14].mxu1  ;;  %1660 = vtanh.f32 %v409_v36  ;;  %1432 = vmatmul.mubr.bf16.gmra.mrb[20].mxu1 %v522_v25  ;;  %v473_v50 = vadd.f32 %v2203_v4, %v472_v38  ;;  %v530_v52 = vpack.c.bf16 %v1639_v39, %v2241_v26  ;;  %1469 = vmatprep.subr.bf16.mxu0 %v1607_v33 }
 0x168   : > { %v1641_v48 = vpop.eup %1640  ;;  %v412_v49 = vadd.f32 %v2203_v4, %v411_v41  ;;  %v475_v51 = vpop.f32.mrb[15].mxu1  ;;  %1662 = vtanh.f32 %v420_v40  ;;  %v484_v56 = vadd.f32 %v1410_v47, %v2203_v4 }
 0x169   : > { %v1643_v53 = vpop.eup %1642  ;;  %v529_v58 = vpack.c.bf16 %v1641_v48, %v1637_v35  ;;  %v476_v60 = vadd.f32 %v2203_v4, %v475_v51 }
 0x16a   : > { %v1645_v59 = vpop.eup %1644  ;;  %1664 = vtanh.f32 %v412_v49  ;;  %1470 = vmatpush3.bf16.msra.mxu0 %v1607_v33 }
 0x16b   : > { %v1647_v61 = vpop.eup %1646  ;;  %1666 = vtanh.f32 %v481_v46  ;;  %1471 = vmatprep.subr.bf16.mxu0 %v1608_v34 }
 0x16c   : > { %v1649_v63 = vpop.eup %1648  ;;  %v524_v0 = vpack.c.bf16 %v1647_v61, %v1643_v53  ;;  %1668 = vtanh.f32 %v473_v50 }
 0x16d   : > { %v1651_v1 = vpop.eup %1650  ;;  %v523_v3 = vpack.c.bf16 %v1649_v63, %v1645_v59  ;;  %1670 = vtanh.f32 %v484_v56 }
 0x16e   : > { %v1653_v5 = vpop.eup %1652  ;;  %1672 = vtanh.f32 %v476_v60  ;;  %1472 = vmatpush3.bf16.msra.mxu0 %v1608_v34 }
 0x16f   : > { %v1655_v6 = vpop.eup %1654  ;;  %1435 = vmatprep.mubr.bf16.mxu1 %v523_v3  ;;  %1473 = vmatprep.subr.bf16.mxu0 %v1609_v62 }
 0x170   : > { %v1657_v7 = vpop.eup %1656  ;;  %1436 = vmatmul.mubr.bf16.gmra.mrb[24].mxu1 %v524_v0  ;;  %v532_v9 = vpack.c.bf16 %v1655_v6, %v1651_v1 }
 0x171   : > { %v1659_v10 = vpop.eup %1658  ;;  %v531_v11 = vpack.c.bf16 %v1657_v7, %v1653_v5 }
 0x172   : > { %v1661_v13 = vpop.eup %1660  ;;  %1474 = vmatpush3.bf16.msra.mxu0 %v1609_v62 }
 0x173   : > { %v1663_v18 = vpop.eup %1662 }
 0x174   : > { %v1665_v4 = vpop.eup %1664  ;;  %v526_v20 = vpack.c.bf16 %v1663_v18, %v1659_v10 }
 0x175   : > { %v1667_v21 = vpop.eup %1666  ;;  %v525_v22 = vpack.c.bf16 %v1665_v4, %v1661_v13 }
 0x176   : > { %v1669_v23 = vpop.eup %1668 }
 0x177   : > { %v1671_v24 = vpop.eup %1670  ;;  %1439 = vmatprep.mubr.bf16.mxu1 %v525_v22 }
 0x178   : > { %v1673_v25 = vpop.eup %1672  ;;  %1440 = vmatmul.mubr.bf16.gmra.mrb[28].mxu1 %v526_v20  ;;  %v534_v26 = vpack.c.bf16 %v1671_v24, %v1667_v21 }
 0x179   : > { %1443 = vmatprep.mubr.bf16.mxu1 %v527_v19  ;;  %v533_v27 = vpack.c.bf16 %v1673_v25, %v1669_v23 }
 0x180   : > { %1444 = vmatmul.mubr.bf16.gmra.mrb[32].mxu1 %v528_v12 }
 0x181   : > { %1447 = vmatprep.mubr.bf16.mxu1 %v529_v58 }
 0x188   : > { %1448 = vmatmul.mubr.bf16.gmra.mrb[36].mxu1 %v530_v52 }
 0x189   : > { %1451 = vmatprep.mubr.bf16.mxu1 %v531_v11 }
 0x190   : > { %1452 = vmatmul.mubr.bf16.gmra.mrb[40].mxu1 %v532_v9 }
 0x191   : > { %1455 = vmatprep.mubr.bf16.mxu1 %v533_v27 }
 0x198   : > { %1456 = vmatmul.mubr.bf16.gmra.mrb[44].mxu1 %v534_v26 }
 0x231   : > { %v1429_v2 = vpop.f32.mrb[16].mxu1 }
 0x232   : > { %v651_v8 = vadd.f32 %v1429_v2, %v2261_v57  ;;  %v642_v12 = vpop.f32.mrb[17].mxu1 }
 0x233   : > { %v643_v19 = vadd.f32 %v2261_v57, %v642_v12  ;;  %v1430_v35 = vpop.f32.mrb[18].mxu1 }
 0x234   : > { %1674 = vtanh.f32 %v651_v8  ;;  %v654_v36 = vadd.f32 %v1430_v35, %v2261_v57  ;;  %v645_v37 = vpop.f32.mrb[19].mxu1 }
 0x235   : > { %1676 = vtanh.f32 %v643_v19  ;;  %v646_v38 = vadd.f32 %v2261_v57, %v645_v37 }
 0x236   : > { %1678 = vtanh.f32 %v654_v36 }
 0x237   : > { %1680 = vtanh.f32 %v646_v38 }
 0x23a   : > { %v1433_v39 = vpop.f32.mrb[20].mxu1 }
 0x23b   : > { %v667_v40 = vadd.f32 %v1433_v39, %v2261_v57  ;;  %v658_v41 = vpop.f32.mrb[21].mxu1 }
 0x23c   : > { %v659_v46 = vadd.f32 %v2261_v57, %v658_v41  ;;  %v1434_v47 = vpop.f32.mrb[22].mxu1 }
 0x23d   : > { %1682 = vtanh.f32 %v667_v40  ;;  %v670_v48 = vadd.f32 %v1434_v47, %v2261_v57  ;;  %v661_v49 = vpop.f32.mrb[23].mxu1 }
 0x23e   : > { %1684 = vtanh.f32 %v659_v46  ;;  %v662_v50 = vadd.f32 %v2261_v57, %v661_v49  ;;  %v1675_v51 = vpop.eup %1674 }
 0x23f   : > { %1686 = vtanh.f32 %v670_v48  ;;  %v1677_v52 = vpop.eup %1676 }
 0x240   : > { %1688 = vtanh.f32 %v662_v50  ;;  %v1679_v53 = vpop.eup %1678 }
 0x241   : > { %v1681_v56 = vpop.eup %1680  ;;  %v802_v59 = vpack.c.bf16 %v1679_v53, %v1675_v51 }
 0x242   : > { %v801_v63 = vpack.c.bf16 %v1681_v56, %v1677_v52 }
 0x243   : > { %v1437_v58 = vpop.f32.mrb[24].mxu1 }
 0x244   : > { %v683_v60 = vadd.f32 %v1437_v58, %v2261_v57  ;;  %v674_v61 = vpop.f32.mrb[25].mxu1  ;;  %1475 = vmatprep.mubr.bf16.mxu0 %v801_v63 }
 0x245   : > { %v675_v0 = vadd.f32 %v2261_v57, %v674_v61  ;;  %v1438_v1 = vpop.f32.mrb[26].mxu1  ;;  %1476 = vmatmul.mubr.bf16.vlgmr.msra.gmra.mrb[16].mxu0 %v802_v59 }
 0x246   : > { %1690 = vtanh.f32 %v683_v60  ;;  %v686_v3 = vadd.f32 %v1438_v1, %v2261_v57  ;;  %v677_v5 = vpop.f32.mrb[27].mxu1 }
 0x247   : > { %1692 = vtanh.f32 %v675_v0  ;;  %v678_v6 = vadd.f32 %v2261_v57, %v677_v5  ;;  %v1683_v7 = vpop.eup %1682 }
 0x248   : > { %1694 = vtanh.f32 %v686_v3  ;;  %v1685_v9 = vpop.eup %1684 }
 0x249   : > { %1696 = vtanh.f32 %v678_v6  ;;  %v1687_v10 = vpop.eup %1686 }
 0x24a   : > { %v1689_v11 = vpop.eup %1688  ;;  %v804_v18 = vpack.c.bf16 %v1687_v10, %v1683_v7 }
 0x24b   : > { %v1441_v13 = vpop.f32.mrb[28].mxu1  ;;  %v803_v21 = vpack.c.bf16 %v1689_v11, %v1685_v9 }
 0x24c   : > { %v699_v4 = vadd.f32 %v1441_v13, %v2261_v57  ;;  %v690_v20 = vpop.f32.mrb[29].mxu1 }
 0x24d   : > { %v691_v22 = vadd.f32 %v2261_v57, %v690_v20  ;;  %v1442_v23 = vpop.f32.mrb[30].mxu1  ;;  %1479 = vmatprep.mubr.bf16.mxu0 %v803_v21 }
 0x24e   : > { %1698 = vtanh.f32 %v699_v4  ;;  %v702_v24 = vadd.f32 %v1442_v23, %v2261_v57  ;;  %v693_v25 = vpop.f32.mrb[31].mxu1  ;;  %1480 = vmatmul.mubr.bf16.gmra.mrb[20].mxu0 %v804_v18 }
 0x24f   : > { %1700 = vtanh.f32 %v691_v22  ;;  %v694_v26 = vadd.f32 %v2261_v57, %v693_v25 }
 0x250   : > { %v1691_v27 = vpop.eup %1690  ;;  %1702 = vtanh.f32 %v702_v24 }
 0x251   : > { %v1693_v32 = vpop.eup %1692  ;;  %1704 = vtanh.f32 %v694_v26 }
 0x252   : > { %v1695_v33 = vpop.eup %1694 }
 0x253   : > { %v1697_v34 = vpop.eup %1696  ;;  %v1445_v62 = vpop.f32.mrb[32].mxu1  ;;  %v806_v2 = vpack.c.bf16 %v1695_v33, %v1691_v27 }
 0x254   : > { %v715_v8 = vadd.f32 %v1445_v62, %v2261_v57  ;;  %v706_v12 = vpop.f32.mrb[33].mxu1  ;;  %v805_v19 = vpack.c.bf16 %v1697_v34, %v1693_v32 }
 0x255   : > { %v707_v35 = vadd.f32 %v2261_v57, %v706_v12  ;;  %v1446_v36 = vpop.f32.mrb[34].mxu1 }
 0x256   : > { %1706 = vtanh.f32 %v715_v8  ;;  %v718_v37 = vadd.f32 %v1446_v36, %v2261_v57  ;;  %v709_v38 = vpop.f32.mrb[35].mxu1  ;;  %1483 = vmatprep.mubr.bf16.mxu0 %v805_v19 }
 0x257   : > { %1708 = vtanh.f32 %v707_v35  ;;  %v710_v39 = vadd.f32 %v2261_v57, %v709_v38  ;;  %1484 = vmatmul.mubr.bf16.gmra.mrb[24].mxu0 %v806_v2 }
 0x258   : > { %v1699_v40 = vpop.eup %1698  ;;  %1710 = vtanh.f32 %v718_v37 }
 0x259   : > { %v1701_v41 = vpop.eup %1700  ;;  %1712 = vtanh.f32 %v710_v39 }
 0x25a   : > { %v1703_v46 = vpop.eup %1702 }
 0x25b   : > { %v1705_v47 = vpop.eup %1704  ;;  %v1449_v48 = vpop.f32.mrb[36].mxu1  ;;  %v808_v49 = vpack.c.bf16 %v1703_v46, %v1699_v40 }
 0x25c   : > { %v731_v50 = vadd.f32 %v1449_v48, %v2261_v57  ;;  %v722_v51 = vpop.f32.mrb[37].mxu1  ;;  %v807_v52 = vpack.c.bf16 %v1705_v47, %v1701_v41 }
 0x25d   : > { %v723_v53 = vadd.f32 %v2261_v57, %v722_v51  ;;  %v1450_v56 = vpop.f32.mrb[38].mxu1 }
 0x25e   : > { %1714 = vtanh.f32 %v731_v50  ;;  %v734_v58 = vadd.f32 %v1450_v56, %v2261_v57  ;;  %v725_v59 = vpop.f32.mrb[39].mxu1  ;;  %1487 = vmatprep.mubr.bf16.mxu0 %v807_v52 }
 0x25f   : > { %1716 = vtanh.f32 %v723_v53  ;;  %v726_v60 = vadd.f32 %v2261_v57, %v725_v59  ;;  %1488 = vmatmul.mubr.bf16.gmra.mrb[28].mxu0 %v808_v49 }
 0x260   : > { %v1707_v61 = vpop.eup %1706  ;;  %1718 = vtanh.f32 %v734_v58 }
 0x261   : > { %v1709_v63 = vpop.eup %1708  ;;  %1720 = vtanh.f32 %v726_v60 }
 0x262   : > { %v1711_v0 = vpop.eup %1710 }
 0x263   : > { %v1713_v1 = vpop.eup %1712  ;;  %v1453_v3 = vpop.f32.mrb[40].mxu1  ;;  %v810_v5 = vpack.c.bf16 %v1711_v0, %v1707_v61 }
 0x264   : > { %v747_v6 = vadd.f32 %v1453_v3, %v2261_v57  ;;  %v738_v7 = vpop.f32.mrb[41].mxu1  ;;  %v809_v9 = vpack.c.bf16 %v1713_v1, %v1709_v63 }
 0x265   : > { %v739_v10 = vadd.f32 %v2261_v57, %v738_v7  ;;  %v1454_v11 = vpop.f32.mrb[42].mxu1 }
 0x266   : > { %1722 = vtanh.f32 %v747_v6  ;;  %v750_v13 = vadd.f32 %v1454_v11, %v2261_v57  ;;  %v741_v18 = vpop.f32.mrb[43].mxu1  ;;  %1491 = vmatprep.mubr.bf16.mxu0 %v809_v9 }
 0x267   : > { %1724 = vtanh.f32 %v739_v10  ;;  %v742_v4 = vadd.f32 %v2261_v57, %v741_v18  ;;  %1492 = vmatmul.mubr.bf16.gmra.mrb[32].mxu0 %v810_v5 }
 0x268   : > { %v1715_v20 = vpop.eup %1714  ;;  %1726 = vtanh.f32 %v750_v13  ;;  %v1802_v13 = vld [vmem:[%s2116_s9] sm:$0xff] }
 0x269   : > { %v1717_v21 = vpop.eup %1716  ;;  %1728 = vtanh.f32 %v742_v4 }
 0x26a   : > { %v1719_v22 = vpop.eup %1718 }
 0x26b   : > { %v1721_v23 = vpop.eup %1720  ;;  %v1457_v24 = vpop.f32.mrb[44].mxu1  ;;  %v812_v25 = vpack.c.bf16 %v1719_v22, %v1715_v20  ;;  %v1803_v22 = vld [vmem:[%s2116_s9 + $0x8] sm:$0xff] }
 0x26c   : > { %v763_v26 = vadd.f32 %v1457_v24, %v2261_v57  ;;  %v754_v27 = vpop.f32.mrb[45].mxu1  ;;  %v811_v32 = vpack.c.bf16 %v1721_v23, %v1717_v21 }
 0x26d   : > { %v755_v33 = vadd.f32 %v2261_v57, %v754_v27  ;;  %v1458_v34 = vpop.f32.mrb[46].mxu1 }
 0x26e   : > { %1730 = vtanh.f32 %v763_v26  ;;  %v766_v62 = vadd.f32 %v1458_v34, %v2261_v57  ;;  %v757_v2 = vpop.f32.mrb[47].mxu1  ;;  %1495 = vmatprep.mubr.bf16.mxu0 %v811_v32 }
 0x26f   : > { %1732 = vtanh.f32 %v755_v33  ;;  %v758_v8 = vadd.f32 %v2261_v57, %v757_v2  ;;  %1496 = vmatmul.mubr.bf16.gmra.mrb[36].mxu0 %v812_v25  ;;  %v2298_v57 = vld [vmem:[%s2452_s2 + $0x2] ss:$0 sm:$0xff] }
 0x270   : > { %v1723_v12 = vpop.eup %1722  ;;  %1734 = vtanh.f32 %v766_v62 }
 0x271   : > { %v1725_v19 = vpop.eup %1724  ;;  %1736 = vtanh.f32 %v758_v8 }
 0x272   : > { %v1727_v35 = vpop.eup %1726 }
 0x273   : > { %v1729_v36 = vpop.eup %1728  ;;  %v814_v37 = vpack.c.bf16 %v1727_v35, %v1723_v12 }
 0x274   : > { %v813_v38 = vpack.c.bf16 %v1729_v36, %v1725_v19 }
 0x276   : > { %1499 = vmatprep.mubr.bf16.mxu0 %v813_v38 }
 0x277   : > { %1500 = vmatmul.mubr.bf16.gmra.mrb[40].mxu0 %v814_v37 }
 0x278   : > { %v1731_v39 = vpop.eup %1730 }
 0x279   : > { %v1733_v40 = vpop.eup %1732 }
 0x27a   : > { %v1735_v41 = vpop.eup %1734 }
 0x27b   : > { %v1737_v46 = vpop.eup %1736  ;;  %v816_v47 = vpack.c.bf16 %v1735_v41, %v1731_v39 }
 0x27c   : > { %v815_v48 = vpack.c.bf16 %v1737_v46, %v1733_v40 }
 0x27e   : > { %1503 = vmatprep.mubr.bf16.mxu0 %v815_v48 }
 0x27f   : > { %1504 = vmatmul.mubr.bf16.gmra.mrb[44].mxu0 %v816_v47 }
 0x318   : > { %v1477_v49 = vpop.f32.mrb[16].mxu0 }
 0x319   : > { %v933_v50 = vadd.f32 %v1477_v49, %v2298_v57  ;;  %v924_v51 = vpop.f32.mrb[17].mxu0 }
 0x31a   : > { %v925_v52 = vadd.f32 %v2298_v57, %v924_v51  ;;  %v1478_v53 = vpop.f32.mrb[18].mxu0 }
 0x31b   : > { %1738 = vtanh.f32 %v933_v50  ;;  %v936_v56 = vadd.f32 %v1478_v53, %v2298_v57  ;;  %v927_v58 = vpop.f32.mrb[19].mxu0 }
 0x31c   : > { %1740 = vtanh.f32 %v925_v52  ;;  %v928_v59 = vadd.f32 %v2298_v57, %v927_v58 }
 0x31d   : > { %1742 = vtanh.f32 %v936_v56 }
 0x31e   : > { %1744 = vtanh.f32 %v928_v59 }
 0x321   : > { %v1481_v60 = vpop.f32.mrb[20].mxu0 }
 0x322   : > { %v949_v61 = vadd.f32 %v1481_v60, %v2298_v57  ;;  %v940_v63 = vpop.f32.mrb[21].mxu0 }
 0x323   : > { %v941_v0 = vadd.f32 %v2298_v57, %v940_v63  ;;  %v1482_v1 = vpop.f32.mrb[22].mxu0 }
 0x324   : > { %1746 = vtanh.f32 %v949_v61  ;;  %v952_v3 = vadd.f32 %v1482_v1, %v2298_v57  ;;  %v943_v5 = vpop.f32.mrb[23].mxu0 }
 0x325   : > { %1748 = vtanh.f32 %v941_v0  ;;  %v944_v6 = vadd.f32 %v2298_v57, %v943_v5  ;;  %v1739_v7 = vpop.eup %1738 }
 0x326   : > { %1750 = vtanh.f32 %v952_v3  ;;  %v1741_v9 = vpop.eup %1740  ;;  %v1085_v10 = vadd.f32 %v1739_v7, %v2131_v14 }
 0x327   : > { %1752 = vtanh.f32 %v944_v6  ;;  %v1743_v11 = vpop.eup %1742  ;;  %v1083_v18 = vadd.f32 %v1802_v13, %v1741_v9 }
 0x328   : > { %v1745_v4 = vpop.eup %1744  ;;  %1117 = vst [vmem:[%s2312_s10 + $0x10] sm:$0xff] %v1085_v10  ;;  %v1086_v20 = vadd.f32 %v1743_v11, %v2134_v15 }
 0x329   : > { %1115 = vst [vmem:[%s2312_s10] sm:$0xff] %v1083_v18  ;;  %v1084_v23 = vadd.f32 %v1803_v22, %v1745_v4  ;;  %v1804_v18 = vld [vmem:[%s2116_s9 + $0x90] sm:$0xff] }
 0x32a   : > { %v1485_v21 = vpop.f32.mrb[24].mxu0  ;;  %1118 = vst [vmem:[%s2312_s10 + $0x18] sm:$0xff] %v1086_v20 }
 0x32b   : > { %v965_v14 = vadd.f32 %v1485_v21, %v2298_v57  ;;  %v956_v24 = vpop.f32.mrb[25].mxu0  ;;  %1116 = vst [vmem:[%s2312_s10 + $0x8] sm:$0xff] %v1084_v23  ;;  %v1805_v21 = vld [vmem:[%s2116_s9 + $0x80] sm:$0xff] }
 0x32c   : > { %v957_v25 = vadd.f32 %v2298_v57, %v956_v24  ;;  %v1486_v26 = vpop.f32.mrb[26].mxu0 }
 0x32d   : > { %1754 = vtanh.f32 %v965_v14  ;;  %v968_v27 = vadd.f32 %v1486_v26, %v2298_v57  ;;  %v959_v32 = vpop.f32.mrb[27].mxu0  ;;  %v1806_v14 = vld [vmem:[%s2116_s9 + $0x98] sm:$0xff]  ;;  %v1807_v26 = vld [vmem:[%s2116_s9 + $0x88] sm:$0xff] }
 0x32e   : > { %1756 = vtanh.f32 %v957_v25  ;;  %v960_v15 = vadd.f32 %v2298_v57, %v959_v32  ;;  %v1747_v33 = vpop.eup %1746 }
 0x32f   : > { %1758 = vtanh.f32 %v968_v27  ;;  %v1749_v34 = vpop.eup %1748  ;;  %v1089_v62 = vadd.f32 %v1747_v33, %v2151_v28 }
 0x330   : > { %1760 = vtanh.f32 %v960_v15  ;;  %v1751_v2 = vpop.eup %1750  ;;  %v1087_v8 = vadd.f32 %v1749_v34, %v2137_v16 }
 0x331   : > { %v1753_v12 = vpop.eup %1752  ;;  %1121 = vst [vmem:[%s2312_s10 + $0x30] sm:$0xff] %v1089_v62  ;;  %v1090_v19 = vadd.f32 %v1751_v2, %v2154_v29 }
 0x332   : > { %v1489_v35 = vpop.f32.mrb[28].mxu0  ;;  %1119 = vst [vmem:[%s2312_s10 + $0x20] sm:$0xff] %v1087_v8  ;;  %v1088_v36 = vadd.f32 %v1753_v12, %v2140_v17 }
 0x333   : > { %v981_v37 = vadd.f32 %v1489_v35, %v2298_v57  ;;  %v972_v38 = vpop.f32.mrb[29].mxu0  ;;  %1122 = vst [vmem:[%s2312_s10 + $0x38] sm:$0xff] %v1090_v19  ;;  %v1808_v35 = vld [vmem:[%s2116_s9 + $0xb0] sm:$0xff] }
 0x334   : > { %v973_v39 = vadd.f32 %v2298_v57, %v972_v38  ;;  %v1490_v28 = vpop.f32.mrb[30].mxu0  ;;  %1120 = vst [vmem:[%s2312_s10 + $0x28] sm:$0xff] %v1088_v36  ;;  %v1809_v38 = vld [vmem:[%s2116_s9 + $0xa0] sm:$0xff] }
 0x335   : > { %1762 = vtanh.f32 %v981_v37  ;;  %v984_v16 = vadd.f32 %v1490_v28, %v2298_v57  ;;  %v975_v40 = vpop.f32.mrb[31].mxu0 }
 0x336   : > { %1764 = vtanh.f32 %v973_v39  ;;  %v976_v29 = vadd.f32 %v2298_v57, %v975_v40 }
 0x337   : > { %v1755_v41 = vpop.eup %1754  ;;  %1766 = vtanh.f32 %v984_v16  ;;  %v1810_v16 = vld [vmem:[%s2116_s9 + $0xb8] sm:$0xff] }
 0x338   : > { %v1757_v17 = vpop.eup %1756  ;;  %v1093_v46 = vadd.f32 %v1755_v41, %v2171_v42  ;;  %1768 = vtanh.f32 %v976_v29  ;;  %v1811_v41 = vld [vmem:[%s2116_s9 + $0xa8] sm:$0xff] }
 0x339   : > { %v1759_v47 = vpop.eup %1758  ;;  %v1091_v48 = vadd.f32 %v1757_v17, %v2157_v30 }
 0x33a   : > { %v1761_v49 = vpop.eup %1760  ;;  %1125 = vst [vmem:[%s2312_s10 + $0x50] sm:$0xff] %v1093_v46  ;;  %v1094_v50 = vadd.f32 %v1759_v47, %v2174_v43  ;;  %v1493_v51 = vpop.f32.mrb[32].mxu0 }
 0x33b   : > { %1123 = vst [vmem:[%s2312_s10 + $0x40] sm:$0xff] %v1091_v48  ;;  %v1092_v52 = vadd.f32 %v1761_v49, %v2160_v31  ;;  %v997_v53 = vadd.f32 %v1493_v51, %v2298_v57  ;;  %v988_v56 = vpop.f32.mrb[33].mxu0 }
 0x33c   : > { %1126 = vst [vmem:[%s2312_s10 + $0x58] sm:$0xff] %v1094_v50  ;;  %v989_v58 = vadd.f32 %v2298_v57, %v988_v56  ;;  %v1494_v42 = vpop.f32.mrb[34].mxu0 }
 0x33d   : > { %1124 = vst [vmem:[%s2312_s10 + $0x48] sm:$0xff] %v1092_v52  ;;  %1770 = vtanh.f32 %v997_v53  ;;  %v1000_v30 = vadd.f32 %v1494_v42, %v2298_v57  ;;  %v991_v59 = vpop.f32.mrb[35].mxu0 }
 0x33e   : > { %1772 = vtanh.f32 %v989_v58  ;;  %v992_v43 = vadd.f32 %v2298_v57, %v991_v59  ;;  %v1812_v58 = vld [vmem:[%s2116_s9 + $0xd0] sm:$0xff]  ;;  %v1813_v59 = vld [vmem:[%s2116_s9 + $0xc0] sm:$0xff] }
 0x33f   : > { %v1763_v60 = vpop.eup %1762  ;;  %1774 = vtanh.f32 %v1000_v30 }
 0x340   : > { %v1765_v31 = vpop.eup %1764  ;;  %v1097_v61 = vadd.f32 %v1763_v60, %v2191_v54  ;;  %1776 = vtanh.f32 %v992_v43 }
 0x341   : > { %v1767_v63 = vpop.eup %1766  ;;  %v1095_v0 = vadd.f32 %v1765_v31, %v2177_v44  ;;  %v1814_v31 = vld [vmem:[%s2116_s9 + $0xd8] sm:$0xff] }
 0x342   : > { %v1769_v1 = vpop.eup %1768  ;;  %1129 = vst [vmem:[%s2312_s10 + $0x70] sm:$0xff] %v1097_v61  ;;  %v1098_v3 = vadd.f32 %v1767_v63, %v2194_v55  ;;  %v1497_v5 = vpop.f32.mrb[36].mxu0 }
 0x343   : > { %1127 = vst [vmem:[%s2312_s10 + $0x60] sm:$0xff] %v1095_v0  ;;  %v1096_v6 = vadd.f32 %v1769_v1, %v2180_v45  ;;  %v1013_v7 = vadd.f32 %v1497_v5, %v2298_v57  ;;  %v1004_v9 = vpop.f32.mrb[37].mxu0 }
 0x344   : > { %1130 = vst [vmem:[%s2312_s10 + $0x78] sm:$0xff] %v1098_v3  ;;  %v1005_v54 = vadd.f32 %v2298_v57, %v1004_v9  ;;  %v1498_v10 = vpop.f32.mrb[38].mxu0  ;;  %v1816_v3 = vld [vmem:[%s2116_s9 + $0xf0] sm:$0xff] }
 0x345   : > { %1128 = vst [vmem:[%s2312_s10 + $0x68] sm:$0xff] %v1096_v6  ;;  %1778 = vtanh.f32 %v1013_v7  ;;  %v1016_v44 = vadd.f32 %v1498_v10, %v2298_v57  ;;  %v1007_v55 = vpop.f32.mrb[39].mxu0  ;;  %v1817_v7 = vld [vmem:[%s2116_s9 + $0xe0] sm:$0xff]  ;;  %v1818_v10 = vld [vmem:[%s2116_s9 + $0xf8] sm:$0xff] }
 0x346   : > { %1780 = vtanh.f32 %v1005_v54  ;;  %v1008_v11 = vadd.f32 %v2298_v57, %v1007_v55  ;;  %v1819_v55 = vld [vmem:[%s2116_s9 + $0xe8] sm:$0xff] }
 0x347   : > { %v1771_v45 = vpop.eup %1770  ;;  %1782 = vtanh.f32 %v1016_v44 }
 0x348   : > { %v1773_v13 = vpop.eup %1772  ;;  %v1101_v4 = vadd.f32 %v1804_v18, %v1771_v45  ;;  %1784 = vtanh.f32 %v1008_v11 }
 0x349   : > { %v1775_v20 = vpop.eup %1774  ;;  %v1099_v22 = vadd.f32 %v1805_v21, %v1773_v13 }
 0x34a   : > { %v1777_v23 = vpop.eup %1776  ;;  %1133 = vst [vmem:[%s2312_s10 + $0x90] sm:$0xff] %v1101_v4  ;;  %v1102_v24 = vadd.f32 %v1806_v14, %v1775_v20  ;;  %v1501_v25 = vpop.f32.mrb[40].mxu0 }
 0x34b   : > { %1131 = vst [vmem:[%s2312_s10 + $0x80] sm:$0xff] %v1099_v22  ;;  %v1100_v27 = vadd.f32 %v1807_v26, %v1777_v23  ;;  %v1029_v32 = vadd.f32 %v1501_v25, %v2298_v57  ;;  %v1020_v15 = vpop.f32.mrb[41].mxu0 }
 0x34c   : > { %1134 = vst [vmem:[%s2312_s10 + $0x98] sm:$0xff] %v1102_v24  ;;  %v1021_v33 = vadd.f32 %v2298_v57, %v1020_v15  ;;  %v1502_v34 = vpop.f32.mrb[42].mxu0 }
 0x34d   : > { %1132 = vst [vmem:[%s2312_s10 + $0x88] sm:$0xff] %v1100_v27  ;;  %1786 = vtanh.f32 %v1029_v32  ;;  %v1032_v62 = vadd.f32 %v1502_v34, %v2298_v57  ;;  %v1023_v2 = vpop.f32.mrb[43].mxu0 }
 0x34e   : > { %1788 = vtanh.f32 %v1021_v33  ;;  %v1024_v8 = vadd.f32 %v2298_v57, %v1023_v2 }
 0x34f   : > { %v1779_v12 = vpop.eup %1778  ;;  %1790 = vtanh.f32 %v1032_v62 }
 0x350   : > { %v1781_v19 = vpop.eup %1780  ;;  %v1105_v36 = vadd.f32 %v1808_v35, %v1779_v12  ;;  %1792 = vtanh.f32 %v1024_v8 }
 0x351   : > { %v1783_v37 = vpop.eup %1782  ;;  %v1103_v39 = vadd.f32 %v1809_v38, %v1781_v19 }
 0x352   : > { %v1785_v28 = vpop.eup %1784  ;;  %1137 = vst [vmem:[%s2312_s10 + $0xb0] sm:$0xff] %v1105_v36  ;;  %v1106_v40 = vadd.f32 %v1810_v16, %v1783_v37  ;;  %v1505_v29 = vpop.f32.mrb[44].mxu0 }
 0x353   : > { %1135 = vst [vmem:[%s2312_s10 + $0xa0] sm:$0xff] %v1103_v39  ;;  %v1104_v17 = vadd.f32 %v1811_v41, %v1785_v28  ;;  %v1045_v46 = vadd.f32 %v1505_v29, %v2298_v57  ;;  %v1036_v47 = vpop.f32.mrb[45].mxu0 }
 0x354   : > { %1138 = vst [vmem:[%s2312_s10 + $0xb8] sm:$0xff] %v1106_v40  ;;  %v1037_v48 = vadd.f32 %v2298_v57, %v1036_v47  ;;  %v1506_v49 = vpop.f32.mrb[46].mxu0 }
 0x355   : > { %1136 = vst [vmem:[%s2312_s10 + $0xa8] sm:$0xff] %v1104_v17  ;;  %1794 = vtanh.f32 %v1045_v46  ;;  %v1048_v50 = vadd.f32 %v1506_v49, %v2298_v57  ;;  %v1039_v51 = vpop.f32.mrb[47].mxu0 }
 0x356   : > { %1796 = vtanh.f32 %v1037_v48  ;;  %v1040_v52 = vadd.f32 %v2298_v57, %v1039_v51  ;;  %v1815_v57 = vld [vmem:[%s2116_s9 + $0xc8] sm:$0xff] }
 0x357   : > { %v1787_v53 = vpop.eup %1786  ;;  %1798 = vtanh.f32 %v1048_v50 }
 0x358   : > { %v1789_v56 = vpop.eup %1788  ;;  %v1109_v42 = vadd.f32 %v1812_v58, %v1787_v53  ;;  %1800 = vtanh.f32 %v1040_v52 }
 0x359   : > { %v1791_v30 = vpop.eup %1790  ;;  %v1107_v43 = vadd.f32 %v1813_v59, %v1789_v56 }
 0x35a   : > { %v1793_v60 = vpop.eup %1792  ;;  %1141 = vst [vmem:[%s2312_s10 + $0xd0] sm:$0xff] %v1109_v42  ;;  %v1110_v61 = vadd.f32 %v1814_v31, %v1791_v30 }
 0x35b   : > { %1139 = vst [vmem:[%s2312_s10 + $0xc0] sm:$0xff] %v1107_v43  ;;  %v1108_v63 = vadd.f32 %v1815_v57, %v1793_v60 }
 0x35c   : > { %1142 = vst [vmem:[%s2312_s10 + $0xd8] sm:$0xff] %v1110_v61 }
 0x35d   : > { %1140 = vst [vmem:[%s2312_s10 + $0xc8] sm:$0xff] %v1108_v63 }
 0x35f   : > { %v1795_v0 = vpop.eup %1794 }
 0x360   : > { %v1797_v1 = vpop.eup %1796  ;;  %v1113_v5 = vadd.f32 %v1816_v3, %v1795_v0 }
 0x361   : > { %v1799_v6 = vpop.eup %1798  ;;  %v1111_v9 = vadd.f32 %v1817_v7, %v1797_v1 }
 0x362   : > { %v1801_v54 = vpop.eup %1800  ;;  %1145 = vst [vmem:[%s2312_s10 + $0xf0] sm:$0xff] %v1113_v5  ;;  %v1114_v44 = vadd.f32 %v1818_v10, %v1799_v6 }
 0x363   : > { %1143 = vst [vmem:[%s2312_s10 + $0xe0] sm:$0xff] %v1111_v9  ;;  %v1112_v11 = vadd.f32 %v1819_v55, %v1801_v54 }
 0x364   : > { %1146 = vst [vmem:[%s2312_s10 + $0xf8] sm:$0xff] %v1114_v44 }
 0x365   : > { %1144 = vst [vmem:[%s2312_s10 + $0xe8] sm:$0xff] %v1112_v11 }
 0x366   : > { %1891 = shalt.err (!%p1888_p7)
}
 0x367   : > { %s1892_s9 = scalar_lea.hbm %s2401_s23, 4096  ;;  %s1896_s4 = scalar_lea.hbm %s2453_s3, 16384 }
 0x368   : > { %p1893_p9 = scmp.ne.s32.totalorder %s2401_s23, %s1892_s9  ;;  %p1897_p5 = scmp.lt.u32.totalorder %s2401_s23, %s2453_s3 }
 0x369   : > { %p1898_p10 = scmp.lt.u32.totalorder %s1896_s4, %s1892_s9  ;;  %p1900_p1 = scmp.lt.u32.totalorder %s1892_s9, %s2401_s23 }
 0x36a   : > { %p1894_p11 = pnand %p1893_p9, %p2062_p12 }
 0x36b   : > { %p1899_p2 = por %p1898_p10, %p1897_p5 }
 0x36c   : > { %p1895_p0 = pneg %p1894_p11 }
 0x36d   : > { %p1901_p4 = por %p1900_p1, %p1899_p2 }
 0x36f   : > { %p1902_p6 = pnand %p1901_p4, %p1895_p0 }
 0x371   : > { %1905 = shalt.err (!%p1902_p6)
}
 0x372   : > { %s1957_s5 = smov 128   ;;  %s1958_s10 = smov 8  }
 0x373   : > { %1529 = dma.vmem_to_hbm [thread:$0]  (%p2062_p12), %s2403_s27, 4096, %s2401_s23, %s1148_s16, %s1957_s5, %s1957_s5, %s1958_s10  }
 0x374 PF: > { %p1546_p8 = scmp.ge.s32.totalorder %s1948_s15, 2  ;;  %s1176_s11 = sand.u32 1, %s1936_s12  }
 0x375   : > { %p2468_p13 = scmp.ne.s32.totalorder %s2458_s19, 0  ;;  %s1177_s28 = scalar_lea.sflag [#allocation4], %s1176_s11 }
 0x377   : > { %p1540_p3 = pnand %p1546_p8, %p2468_p13 }
 0x379   : > { %1931 = dma.done.wait (!%p1540_p3), %s1177_s28, 4096  }
 0x37a   : > { %1933 = vsyncadd (!%p1540_p3), %s1177_s28, 4294963200  ;;  %p17_p7 = scmp.ge.s32.totalorder %s2032_s24, 6   ;;  %s2469_s12 = smov %s1940_s13 }
 0x37b   : > { %s2470_s13 = smov %s1944_s14  ;;  %s2471_s14 = smov %s2058_s17 }
 0x37c   : > { %s2472_s15 = smov %s2032_s24  ;;  %19 = sbr.rel (!%p17_p7) target bundleno = 6 (0x6), region = 85 }
 0x383   :  { %1182 = vsyncpa [#allocation3], 1 }
 0x384   :  { %1184 = vsyncpa [#allocation3 + $0x1], 1 }
 0x385   :  { %1185 = vsyncpa [#allocation6], 1 }
 0x386   :  { %1186 = vsyncpa [#allocation4], 1 }
 0x387   :  { %1188 = vsyncpa [#allocation4 + $0x1], 1 }

</bundles_post_ra>
